<compile_context>
chip_gen: v7x
topology: tpu7x:2x2x1
jax: 0.10.0
libtpu: 0.0.40
codegen_flags: <defaults>
</compile_context>

<pallas_src>
import functools

import jax
import jax.numpy as jnp
from jax.experimental import pallas as pl
from jax.experimental.pallas import tpu as pltpu

ENTRY_LEN = 3 * 32 * 32  # CIFAR-10 flattened image length = 3072
H1 = 256
H2 = 64
NUM_CLASSES = 10
OUT_PAD = 128            # lane-dense logits width (>= NUM_CLASSES, multiple of 128)


def _round_up(x, m):
    return (x + m - 1) // m * m


def simplenet_kernel(x_ref, w1_ref, b1_ref, w2_ref, b2_ref, w3_ref, b3_ref, o_ref):
    # Whole forward pass fused; one invocation per batch tile.
    # x arrives in its native (f32) layout; cast to bf16 in-register for the MXU.
    x = x_ref[...].astype(jnp.bfloat16)                                  # (tb, 3072)

    # fc1 + sigmoid  (bf16 MXU matmul, f32 accumulate, f32 sigmoid on EUP)
    h1 = jnp.dot(x, w1_ref[...], preferred_element_type=jnp.float32)     # (tb, 256) f32
    h1 = jax.nn.sigmoid(h1 + b1_ref[...]).astype(jnp.bfloat16)

    # fc2 + sigmoid
    h2 = jnp.dot(h1, w2_ref[...], preferred_element_type=jnp.float32)    # (tb, 64) f32
    h2 = jax.nn.sigmoid(h2 + b2_ref[...]).astype(jnp.bfloat16)

    # fc3 (logits, no activation) -- output columns padded to 128 lanes
    logits = jnp.dot(h2, w3_ref[...], preferred_element_type=jnp.float32)  # (tb, 128)
    logits = logits + b3_ref[...]

    o_ref[...] = logits.astype(o_ref.dtype)                              # bf16 writeback


@functools.partial(jax.jit, static_argnames=("tb",))
def simplenet_forward(x, w1, b1, w2, b2, w3, b3, *, tb=512):
    B, D = x.shape
    assert D == ENTRY_LEN

    # Effective batch tile: clamp to the batch, multiple of 16 so bf16 tiles fill whole
    # [16,128] vregs.  The ragged tail is handled by the cdiv grid + masked last tile
    # (no padding pass over x).  For very large B on v7x prefer tb such that the grid has
    # an even number of (>= 8) steps so both TensorCores stay busy.
    tb_eff = _round_up(min(tb, _round_up(B, 16)), 16)
    grid = (pl.cdiv(B, tb_eff),)

    # Weights are tiny and resident across the grid: stream them in bf16.  Biases stay
    # f32 (added to the f32 accumulator).
    w1b = w1.astype(jnp.bfloat16)
    w2b = w2.astype(jnp.bfloat16)
    w3b = jnp.pad(w3.astype(jnp.bfloat16), ((0, 0), (0, OUT_PAD - NUM_CLASSES)))
    b1f = b1.astype(jnp.float32)
    b2f = b2.astype(jnp.float32)
    b3f = jnp.pad(b3.astype(jnp.float32), ((0, 0), (0, OUT_PAD - NUM_CLASSES)))

    # Advisory cost estimate for XLA scheduling around the custom call.
    flops = 2 * B * (ENTRY_LEN * H1 + H1 * H2 + H2 * OUT_PAD)
    transcendentals = B * (H1 + H2)  # one exp per sigmoid
    bytes_accessed = (
        B * ENTRY_LEN * x.dtype.itemsize                       # x in native dtype
        + (ENTRY_LEN * H1 + H1 * H2 + H2 * OUT_PAD) * 2        # weights (bf16)
        + (H1 + H2 + OUT_PAD) * 4                              # biases (f32)
        + B * OUT_PAD * 2                                      # logits (bf16)
    )

    # Weights/biases get a full-array block with a constant index_map => fetched once and
    # kept resident in VMEM across the batch grid.
    full = lambda shape: pl.BlockSpec(shape, lambda i: (0,) * len(shape))

    out = pl.pallas_call(
        simplenet_kernel,
        out_shape=jax.ShapeDtypeStruct((B, OUT_PAD), jnp.bfloat16),
        grid_spec=pltpu.PrefetchScalarGridSpec(
            num_scalar_prefetch=0,
            grid=grid,
            in_specs=[
                pl.BlockSpec((tb_eff, ENTRY_LEN), lambda i: (i, 0)),  # x tile (native dtype)
                full((ENTRY_LEN, H1)),                                # W1
                full((1, H1)),                                        # b1
                full((H1, H2)),                                       # W2
                full((1, H2)),                                        # b2
                full((H2, OUT_PAD)),                                  # W3 (padded)
                full((1, OUT_PAD)),                                   # b3 (padded)
            ],
            out_specs=pl.BlockSpec((tb_eff, OUT_PAD), lambda i: (i, 0)),
        ),
        compiler_params=pltpu.CompilerParams(
            dimension_semantics=("parallel",),
            # ~20 MiB actually needed at tb=512 (f32 x tile 6 MiB x2, weights ~3 MiB,
            # temps, bf16 out); 32 MiB is within the default scoped limit on v6e/v7x and
            # leaves headroom on v7x's 64 MiB physical VMEM.
            vmem_limit_bytes=32 * 1024 * 1024,
        ),
        cost_estimate=pl.CostEstimate(
            flops=flops,
            transcendentals=transcendentals,
            bytes_accessed=bytes_accessed,
        ),
    )(x, w1b, b1f, w2b, b2f, w3b, b3f)

    # Slice off the padded logit columns; cast back to f32 for interface parity with the
    # PyTorch module (negligible: (B, 10) elements).
    return out[:, :NUM_CLASSES].astype(jnp.float32)


def init_linear(key, fan_in, fan_out):
    """Deterministic init mimicking PyTorch nn.Linear (uniform +/- 1/sqrt(fan_in)).

    Returns W with shape (fan_in, fan_out) — already transposed for x @ W."""
    kw, kb = jax.random.split(key)
    bound = 1.0 / jnp.sqrt(jnp.float32(fan_in))
    w = jax.random.uniform(kw, (fan_in, fan_out), jnp.float32, -bound, bound)
    b = jax.random.uniform(kb, (1, fan_out), jnp.float32, -bound, bound)
    return w, b


def reference_forward(x, w1, b1, w2, b2, w3, b3):
    # Pure f32 reference of the PyTorch module.
    h1 = jax.nn.sigmoid(x @ w1 + b1)
    h2 = jax.nn.sigmoid(h1 @ w2 + b2)
    return h2 @ w3 + b3


if __name__ == "__main__":
    key = jax.random.PRNGKey(0)
    kx, k1, k2, k3 = jax.random.split(key, 4)

    # Small demo batch; 40 is deliberately not a multiple of 16 to exercise the masked
    # ragged-tail path (tile clamps to 48, last-block output rows are discarded).
    B = 40
    x = jax.random.normal(kx, (B, ENTRY_LEN), jnp.float32)

    w1, b1 = init_linear(k1, ENTRY_LEN, H1)
    w2, b2 = init_linear(k2, H1, H2)
    w3, b3 = init_linear(k3, H2, NUM_CLASSES)

    out = simplenet_forward(x, w1, b1, w2, b2, w3, b3)
    out = jax.block_until_ready(out)

    ref = reference_forward(x, w1, b1, w2, b2, w3, b3)
    assert out.shape == (B, NUM_CLASSES)
    assert bool(jnp.all(jnp.isfinite(out)))
    # bf16 streaming + f32 accumulation + bf16 logit writeback vs. f32 reference.
    assert jnp.allclose(out, ref, atol=3e-2, rtol=3e-2), "mismatch vs reference"

    print("KERNEL_OK")
</pallas_src>

<mosaic_0001>
module attributes {stable_mosaic.version = 11 : i64} {
  func.func @simplenet_kernel(%arg0: i32, %arg1: memref<48x3072xf32, #tpu.memory_space<vmem>>, %arg2: memref<3072x256xbf16, #tpu.memory_space<vmem>>, %arg3: memref<1x256xf32, #tpu.memory_space<vmem>>, %arg4: memref<256x64xbf16, #tpu.memory_space<vmem>>, %arg5: memref<1x64xf32, #tpu.memory_space<vmem>>, %arg6: memref<64x128xbf16, #tpu.memory_space<vmem>>, %arg7: memref<1x128xf32, #tpu.memory_space<vmem>>, %arg8: memref<48x128xbf16, #tpu.memory_space<vmem>>) attributes {dimension_semantics = [#tpu.dimension_semantics<parallel>], iteration_bounds = array<i64: 1>, scalar_prefetch = 0 : i64, scratch_operands = 0 : i64, tpu.core_type = #tpu.core_type<tc>, window_params = [{transform_indices = @transform_0, window_bounds = array<i64: 48, 3072>}, {pipeline_mode = #tpu.pipeline_mode<synchronous>, transform_indices = @transform_1, window_bounds = array<i64: 3072, 256>}, {pipeline_mode = #tpu.pipeline_mode<synchronous>, transform_indices = @transform_2, window_bounds = array<i64: 1, 256>}, {pipeline_mode = #tpu.pipeline_mode<synchronous>, transform_indices = @transform_3, window_bounds = array<i64: 256, 64>}, {pipeline_mode = #tpu.pipeline_mode<synchronous>, transform_indices = @transform_4, window_bounds = array<i64: 1, 64>}, {pipeline_mode = #tpu.pipeline_mode<synchronous>, transform_indices = @transform_5, window_bounds = array<i64: 64, 128>}, {pipeline_mode = #tpu.pipeline_mode<synchronous>, transform_indices = @transform_6, window_bounds = array<i64: 1, 128>}, {transform_indices = @transform_7, window_bounds = array<i64: 48, 128>}]} {
    %c0 = arith.constant 0 : index
    %c0_0 = arith.constant 0 : index
    %0 = vector.load %arg1[%c0, %c0_0] : memref<48x3072xf32, #tpu.memory_space<vmem>>, vector<48x3072xf32>
    %1 = arith.truncf %0 : vector<48x3072xf32> to vector<48x3072xbf16>
    %c0_1 = arith.constant 0 : index
    %c0_2 = arith.constant 0 : index
    %2 = vector.load %arg2[%c0_1, %c0_2] : memref<3072x256xbf16, #tpu.memory_space<vmem>>, vector<3072x256xbf16>
    %cst = arith.constant dense<0.000000e+00> : vector<48x256xf32>
    %3 = tpu.matmul %1, %2, %cst {dimension_numbers = #tpu.dot_dimension_numbers<[1], [0], [0], [1], [0, 0, 1, 1], [], []>} : vector<48x3072xbf16>, vector<3072x256xbf16>, vector<48x256xf32> -> vector<48x256xf32>
    %c0_3 = arith.constant 0 : index
    %c0_4 = arith.constant 0 : index
    %4 = vector.load %arg3[%c0_3, %c0_4] : memref<1x256xf32, #tpu.memory_space<vmem>>, vector<1x256xf32>
    %5 = vector.broadcast %4 : vector<1x256xf32> to vector<48x256xf32>
    %6 = arith.addf %3, %5 : vector<48x256xf32>
    %7 = arith.negf %6 : vector<48x256xf32>
    %8 = math.exp %7 : vector<48x256xf32>
    %cst_5 = arith.constant 1.000000e+00 : f32
    %9 = vector.broadcast %cst_5 : f32 to vector<48x256xf32>
    %10 = arith.addf %9, %8 : vector<48x256xf32>
    %11 = arith.divf %9, %10 : vector<48x256xf32>
    %12 = arith.truncf %11 : vector<48x256xf32> to vector<48x256xbf16>
    %c0_6 = arith.constant 0 : index
    %c0_7 = arith.constant 0 : index
    %13 = vector.load %arg4[%c0_6, %c0_7] : memref<256x64xbf16, #tpu.memory_space<vmem>>, vector<256x64xbf16>
    %cst_8 = arith.constant dense<0.000000e+00> : vector<48x64xf32>
    %14 = tpu.matmul %12, %13, %cst_8 {dimension_numbers = #tpu.dot_dimension_numbers<[1], [0], [0], [1], [0, 0, 1, 1], [], []>} : vector<48x256xbf16>, vector<256x64xbf16>, vector<48x64xf32> -> vector<48x64xf32>
    %c0_9 = arith.constant 0 : index
    %c0_10 = arith.constant 0 : index
    %15 = vector.load %arg5[%c0_9, %c0_10] : memref<1x64xf32, #tpu.memory_space<vmem>>, vector<1x64xf32>
    %16 = vector.broadcast %15 : vector<1x64xf32> to vector<48x64xf32>
    %17 = arith.addf %14, %16 : vector<48x64xf32>
    %18 = arith.negf %17 : vector<48x64xf32>
    %19 = math.exp %18 : vector<48x64xf32>
    %cst_11 = arith.constant 1.000000e+00 : f32
    %20 = vector.broadcast %cst_11 : f32 to vector<48x64xf32>
    %21 = arith.addf %20, %19 : vector<48x64xf32>
    %22 = arith.divf %20, %21 : vector<48x64xf32>
    %23 = arith.truncf %22 : vector<48x64xf32> to vector<48x64xbf16>
    %c0_12 = arith.constant 0 : index
    %c0_13 = arith.constant 0 : index
    %24 = vector.load %arg6[%c0_12, %c0_13] : memref<64x128xbf16, #tpu.memory_space<vmem>>, vector<64x128xbf16>
    %cst_14 = arith.constant dense<0.000000e+00> : vector<48x128xf32>
    %25 = tpu.matmul %23, %24, %cst_14 {dimension_numbers = #tpu.dot_dimension_numbers<[1], [0], [0], [1], [0, 0, 1, 1], [], []>} : vector<48x64xbf16>, vector<64x128xbf16>, vector<48x128xf32> -> vector<48x128xf32>
    %c0_15 = arith.constant 0 : index
    %c0_16 = arith.constant 0 : index
    %26 = vector.load %arg7[%c0_15, %c0_16] : memref<1x128xf32, #tpu.memory_space<vmem>>, vector<1x128xf32>
    %27 = vector.broadcast %26 : vector<1x128xf32> to vector<48x128xf32>
    %28 = arith.addf %25, %27 : vector<48x128xf32>
    %29 = arith.truncf %28 : vector<48x128xf32> to vector<48x128xbf16>
    %c0_17 = arith.constant 0 : index
    %c0_18 = arith.constant 0 : index
    %30 = vector.load %arg8[%c0_17, %c0_18] : memref<48x128xbf16, #tpu.memory_space<vmem>>, vector<48x128xbf16>
    tpu.vector_store %arg8[%c0_17, %c0_18], %29 {strides = array<i32>} : memref<48x128xbf16, #tpu.memory_space<vmem>>, vector<48x128xbf16>,
    return
  }
  func.func @transform_0(%arg0: i32) -> (i32, i32) {
    %c0_i32 = arith.constant 0 : i32
    %c0_i32_0 = arith.constant 0 : i32
    return %arg0, %c0_i32 : i32, i32
  }
  func.func @transform_1(%arg0: i32) -> (i32, i32) {
    %c0_i32 = arith.constant 0 : i32
    %c0_i32_0 = arith.constant 0 : i32
    %c0_i32_1 = arith.constant 0 : i32
    return %c0_i32, %c0_i32_0 : i32, i32
  }
  func.func @transform_2(%arg0: i32) -> (i32, i32) {
    %c0_i32 = arith.constant 0 : i32
    %c0_i32_0 = arith.constant 0 : i32
    %c0_i32_1 = arith.constant 0 : i32
    return %c0_i32, %c0_i32_0 : i32, i32
  }
  func.func @transform_3(%arg0: i32) -> (i32, i32) {
    %c0_i32 = arith.constant 0 : i32
    %c0_i32_0 = arith.constant 0 : i32
    %c0_i32_1 = arith.constant 0 : i32
    return %c0_i32, %c0_i32_0 : i32, i32
  }
  func.func @transform_4(%arg0: i32) -> (i32, i32) {
    %c0_i32 = arith.constant 0 : i32
    %c0_i32_0 = arith.constant 0 : i32
    %c0_i32_1 = arith.constant 0 : i32
    return %c0_i32, %c0_i32_0 : i32, i32
  }
  func.func @transform_5(%arg0: i32) -> (i32, i32) {
    %c0_i32 = arith.constant 0 : i32
    %c0_i32_0 = arith.constant 0 : i32
    %c0_i32_1 = arith.constant 0 : i32
    return %c0_i32, %c0_i32_0 : i32, i32
  }
  func.func @transform_6(%arg0: i32) -> (i32, i32) {
    %c0_i32 = arith.constant 0 : i32
    %c0_i32_0 = arith.constant 0 : i32
    %c0_i32_1 = arith.constant 0 : i32
    return %c0_i32, %c0_i32_0 : i32, i32
  }
  func.func @transform_7(%arg0: i32) -> (i32, i32) {
    %c0_i32 = arith.constant 0 : i32
    %c0_i32_0 = arith.constant 0 : i32
    return %arg0, %c0_i32 : i32, i32
  }
}

</mosaic_0001>

<bundles_post_ra>
// kernel: simplenet_forward.1
= control target key start
LH: loop header
LB: loop body
LE: loop exit
PB: predicated region body
PF: predicated region fallthrough
CT: control target
= control target key end

     0   :  { %vm5155_vm0 = vmmov 0   ;;  %vm3663_vm1 = vcmask 523264   ;;  %s6887_s0 = inlined_call_operand.vmem [shape: f32[40,3072], index: 0, kind: input, shape index: {}]   ;;  %s6888_s1 = inlined_call_operand.vmem [shape: bf16[3072,256], index: 1, kind: input, shape index: {}]   ;;  %s6889_s2 = inlined_call_operand.vmem [shape: f32[1,256], index: 2, kind: input, shape index: {}]   ;;  %s6890_s3 = inlined_call_operand.vmem [shape: bf16[256,64], index: 3, kind: input, shape index: {}]   ;;  %s6891_s4 = inlined_call_operand.vmem [shape: f32[1,64], index: 4, kind: input, shape index: {}]   ;;  %s6892_s5 = inlined_call_operand.vmem [shape: bf16[64,128], index: 5, kind: input, shape index: {}]   ;;  %s6893_s6 = inlined_call_operand.vmem [shape: f32[1,128], index: 6, kind: input, shape index: {}]   ;;  %s6894_s7 = inlined_call_operand.vmem [shape: bf16[40,128], index: 7, kind: output, shape index: {}]  }
   0x1   :  { %v4486_v0 = vld [vmem:[%s6888_s1 + $0x4] ss:$8 sps:$4 sm:$0xff]   ;;  %v4490_v2 = vld [vmem:[%s6888_s1] ss:$8 sps:$4 sm:$0xff]   ;;  %v4492_v4 = vld [vmem:[%s6888_s1 + $0x14] ss:$8 sps:$4 sm:$0xff]  }
   0x2   :  { %v4488_v1 = vld [vmem:[%s6888_s1 + $0x604] ss:$8 sps:$4 sm:$0xff]   ;;  %2559 = vmatprep.subr.bf16.mxu1 %v4486_v0  ;;  %v4491_v3 = vld [vmem:[%s6888_s1 + $0x600] ss:$8 sps:$4 sm:$0xff]   ;;  %v4494_v5 = vld [vmem:[%s6888_s1 + $0x614] ss:$8 sps:$4 sm:$0xff]  }
   0x3   :  { %2937 = vmatprep.subr.bf16.mxu0 %v4488_v1  ;;  %2560 = vmatpush1.bf16.msra.mxu1 %v4490_v2  ;;  %v4496_v6 = vld [vmem:[%s6888_s1 + $0x10] ss:$8 sps:$4 sm:$0xff]   ;;  %v4498_v8 = vld [vmem:[%s6888_s1 + $0x24] ss:$8 sps:$4 sm:$0xff]   ;;  %v4502_v10 = vld [vmem:[%s6888_s1 + $0x20] ss:$8 sps:$4 sm:$0xff]  }
   0x4   :  { %2938 = vmatpush1.bf16.msra.mxu0 %v4491_v3  ;;  %2561 = vmatprep.subr.bf16.mxu1 %v4492_v4  ;;  %v4497_v7 = vld [vmem:[%s6888_s1 + $0x610] ss:$8 sps:$4 sm:$0xff]   ;;  %v4500_v9 = vld [vmem:[%s6888_s1 + $0x624] ss:$8 sps:$4 sm:$0xff]   ;;  %v4503_v11 = vld [vmem:[%s6888_s1 + $0x620] ss:$8 sps:$4 sm:$0xff]  }
   0x5   :  { %2939 = vmatprep.subr.bf16.mxu0 %v4494_v5  ;;  %v4504_v12 = vld [vmem:[%s6888_s1 + $0x34] ss:$8 sps:$4 sm:$0xff]   ;;  %v4508_v14 = vld [vmem:[%s6888_s1 + $0x30] ss:$8 sps:$4 sm:$0xff]   ;;  %v4510_v16 = vld [vmem:[%s6888_s1 + $0x44] ss:$8 sps:$4 sm:$0xff]  }
   0x6   :  { %v4506_v13 = vld [vmem:[%s6888_s1 + $0x634] ss:$8 sps:$4 sm:$0xff]   ;;  %v4509_v15 = vld [vmem:[%s6888_s1 + $0x630] ss:$8 sps:$4 sm:$0xff]   ;;  %v4512_v17 = vld [vmem:[%s6888_s1 + $0x644] ss:$8 sps:$4 sm:$0xff]  }
   0x7   :  { %2562 = vmatpush1.bf16.msra.mxu1 %v4496_v6  ;;  %v4514_v18 = vld [vmem:[%s6888_s1 + $0x40] ss:$8 sps:$4 sm:$0xff]   ;;  %v4516_v20 = vld [vmem:[%s6888_s1 + $0x54] ss:$8 sps:$4 sm:$0xff]   ;;  %v4520_v22 = vld [vmem:[%s6888_s1 + $0x50] ss:$8 sps:$4 sm:$0xff]  }
   0x8   :  { %2940 = vmatpush1.bf16.msra.mxu0 %v4497_v7  ;;  %2563 = vmatprep.subr.bf16.mxu1 %v4498_v8  ;;  %v4515_v19 = vld [vmem:[%s6888_s1 + $0x640] ss:$8 sps:$4 sm:$0xff]   ;;  %v4518_v21 = vld [vmem:[%s6888_s1 + $0x654] ss:$8 sps:$4 sm:$0xff]   ;;  %v4521_v23 = vld [vmem:[%s6888_s1 + $0x650] ss:$8 sps:$4 sm:$0xff]  }
   0x9   :  { %2941 = vmatprep.subr.bf16.mxu0 %v4500_v9  ;;  %v4522_v24 = vld [vmem:[%s6888_s1 + $0x64] ss:$8 sps:$4 sm:$0xff]   ;;  %v4526_v26 = vld [vmem:[%s6888_s1 + $0x60] ss:$8 sps:$4 sm:$0xff]   ;;  %v4528_v28 = vld [vmem:[%s6888_s1 + $0x74] ss:$8 sps:$4 sm:$0xff]  }
   0xa   :  { %v4524_v25 = vld [vmem:[%s6888_s1 + $0x664] ss:$8 sps:$4 sm:$0xff]   ;;  %v4527_v27 = vld [vmem:[%s6888_s1 + $0x660] ss:$8 sps:$4 sm:$0xff]   ;;  %v4530_v29 = vld [vmem:[%s6888_s1 + $0x674] ss:$8 sps:$4 sm:$0xff]  }
   0xb   :  { %2564 = vmatpush1.bf16.msra.mxu1 %v4502_v10  ;;  %v4532_v30 = vld [vmem:[%s6888_s1 + $0x70] ss:$8 sps:$4 sm:$0xff]   ;;  %v4534_v32 = vld [vmem:[%s6888_s1 + $0x84] ss:$8 sps:$4 sm:$0xff]   ;;  %v4538_v34 = vld [vmem:[%s6888_s1 + $0x80] ss:$8 sps:$4 sm:$0xff]  }
   0xc   :  { %2942 = vmatpush1.bf16.msra.mxu0 %v4503_v11  ;;  %2565 = vmatprep.subr.bf16.mxu1 %v4504_v12  ;;  %v4533_v31 = vld [vmem:[%s6888_s1 + $0x670] ss:$8 sps:$4 sm:$0xff]   ;;  %v4536_v33 = vld [vmem:[%s6888_s1 + $0x684] ss:$8 sps:$4 sm:$0xff]   ;;  %v4539_v35 = vld [vmem:[%s6888_s1 + $0x680] ss:$8 sps:$4 sm:$0xff]  }
   0xd   :  { %2943 = vmatprep.subr.bf16.mxu0 %v4506_v13  ;;  %v4540_v36 = vld [vmem:[%s6888_s1 + $0x94] ss:$8 sps:$4 sm:$0xff]   ;;  %v4544_v38 = vld [vmem:[%s6888_s1 + $0x90] ss:$8 sps:$4 sm:$0xff]   ;;  %v4546_v40 = vld [vmem:[%s6888_s1 + $0xa4] ss:$8 sps:$4 sm:$0xff]  }
   0xe   :  { %v4542_v37 = vld [vmem:[%s6888_s1 + $0x694] ss:$8 sps:$4 sm:$0xff]   ;;  %v4545_v39 = vld [vmem:[%s6888_s1 + $0x690] ss:$8 sps:$4 sm:$0xff]   ;;  %v4548_v41 = vld [vmem:[%s6888_s1 + $0x6a4] ss:$8 sps:$4 sm:$0xff]  }
   0xf   :  { %2566 = vmatpush1.bf16.msra.mxu1 %v4508_v14  ;;  %v4550_v42 = vld [vmem:[%s6888_s1 + $0xa0] ss:$8 sps:$4 sm:$0xff]   ;;  %v4552_v44 = vld [vmem:[%s6888_s1 + $0xb4] ss:$8 sps:$4 sm:$0xff]   ;;  %v4556_v46 = vld [vmem:[%s6888_s1 + $0xb0] ss:$8 sps:$4 sm:$0xff]  }
  0x10   :  { %2944 = vmatpush1.bf16.msra.mxu0 %v4509_v15  ;;  %2567 = vmatprep.subr.bf16.mxu1 %v4510_v16  ;;  %v4551_v43 = vld [vmem:[%s6888_s1 + $0x6a0] ss:$8 sps:$4 sm:$0xff]   ;;  %v4554_v45 = vld [vmem:[%s6888_s1 + $0x6b4] ss:$8 sps:$4 sm:$0xff]   ;;  %v4557_v47 = vld [vmem:[%s6888_s1 + $0x6b0] ss:$8 sps:$4 sm:$0xff]  }
  0x11   :  { %2945 = vmatprep.subr.bf16.mxu0 %v4512_v17  ;;  %v28_v48 = vld [vmem:[%s6887_s0 + $0x8] sm:$0xff]  ;;  %v4564_v58 = vld [vmem:[%s6888_s1 + $0xd4] ss:$8 sps:$4 sm:$0xff]   ;;  %v4568_v60 = vld [vmem:[%s6888_s1 + $0xd0] ss:$8 sps:$4 sm:$0xff]  }
  0x12   :  { %v52_v49 = vld [vmem:[%s6887_s0 + $0xc8] sm:$0xff]  ;;  %v4566_v59 = vld [vmem:[%s6888_s1 + $0x6d4] ss:$8 sps:$4 sm:$0xff]   ;;  %v4569_v61 = vld [vmem:[%s6888_s1 + $0x6d0] ss:$8 sps:$4 sm:$0xff]  }
  0x13   :  { %2568 = vmatpush1.bf16.msra.mxu1 %v4514_v18  ;;  %v4558_v50 = vld [vmem:[%s6888_s1 + $0xc4] ss:$8 sps:$4 sm:$0xff]   ;;  %v172_v52 = vpack.c.bf16 %v52_v49, %v28_v48  ;;  %v4562_v56 = vld [vmem:[%s6888_s1 + $0xc0] ss:$8 sps:$4 sm:$0xff]   ;;  %v4576_v2 = vld [vmem:[%s6888_s1 + $0xf4] ss:$8 sps:$4 sm:$0xff]  }
  0x14   :  { %2946 = vmatpush1.bf16.msra.mxu0 %v4515_v19  ;;  %2569 = vmatprep.subr.bf16.mxu1 %v4516_v20  ;;  %v4560_v51 = vld [vmem:[%s6888_s1 + $0x6c4] ss:$8 sps:$4 sm:$0xff]   ;;  %v4563_v57 = vld [vmem:[%s6888_s1 + $0x6c0] ss:$8 sps:$4 sm:$0xff]   ;;  %v4578_v3 = vld [vmem:[%s6888_s1 + $0x6f4] ss:$8 sps:$4 sm:$0xff]  }
  0x15   :  { %2947 = vmatprep.subr.bf16.mxu0 %v4518_v21  ;;  %v40_v53 = vld [vmem:[%s6887_s0 + $0x68] sm:$0xff]  ;;  %2591 = vmatprep.mubr.bf16.mxu1 %v172_v52  ;;  %v4580_v4 = vld [vmem:[%s6888_s1 + $0xf0] ss:$8 sps:$4 sm:$0xff]   ;;  %v27_v6 = vld [vmem:[%s6887_s0] sm:$0xff] }
  0x16   :  { %v64_v54 = vld [vmem:[%s6887_s0 + $0x128] sm:$0xff]  ;;  %v4581_v5 = vld [vmem:[%s6888_s1 + $0x6f0] ss:$8 sps:$4 sm:$0xff]   ;;  %v51_v8 = vld [vmem:[%s6887_s0 + $0xc0] sm:$0xff] }
  0x17   :  { %2570 = vmatpush1.bf16.msra.mxu1 %v4520_v22  ;;  %v184_v55 = vpack.c.bf16 %v64_v54, %v40_v53  ;;  %v4570_v62 = vld [vmem:[%s6888_s1 + $0xe4] ss:$8 sps:$4 sm:$0xff]   ;;  %v4574_v0 = vld [vmem:[%s6888_s1 + $0xe0] ss:$8 sps:$4 sm:$0xff]   ;;  %v171_v14 = vpack.c.bf16 %v51_v8, %v27_v6  ;;  %v4590_v16 = vld [vmem:[%s6888_s1 + $0x114] ss:$8 sps:$4 sm:$0xff]  }
  0x18   :  { %2948 = vmatpush1.bf16.msra.mxu0 %v4521_v23  ;;  %2571 = vmatprep.subr.bf16.mxu1 %v4522_v24  ;;  %v4572_v63 = vld [vmem:[%s6888_s1 + $0x6e4] ss:$8 sps:$4 sm:$0xff]   ;;  %v4575_v1 = vld [vmem:[%s6888_s1 + $0x6e0] ss:$8 sps:$4 sm:$0xff]   ;;  %v4593_v17 = vld [vmem:[%s6888_s1 + $0x714] ss:$8 sps:$4 sm:$0xff]  }
  0x19   :  { %2949 = vmatprep.subr.bf16.mxu0 %v4524_v25  ;;  %2969 = vmatprep.mubr.bf16.mxu0 %v184_v55  ;;  %v4584_v7 = vld [vmem:[%s6888_s1 + $0x104] ss:$8 sps:$4 sm:$0xff]   ;;  %v4582_v12 = vld [vmem:[%s6888_s1 + $0x100] ss:$8 sps:$4 sm:$0xff]   ;;  %v4588_v18 = vld [vmem:[%s6888_s1 + $0x110] ss:$8 sps:$4 sm:$0xff]  }
  0x1a   :  { %v39_v9 = vld [vmem:[%s6887_s0 + $0x60] sm:$0xff]  ;;  %v4591_v19 = vld [vmem:[%s6888_s1 + $0x710] ss:$8 sps:$4 sm:$0xff]   ;;  %v4602_v24 = vld [vmem:[%s6888_s1 + $0x134] ss:$8 sps:$4 sm:$0xff]  }
  0x1b   :  { %2572 = vmatpush1.bf16.msra.mxu1 %v4526_v26  ;;  %v63_v10 = vld [vmem:[%s6887_s0 + $0x120] sm:$0xff]  ;;  %v4605_v25 = vld [vmem:[%s6888_s1 + $0x734] ss:$8 sps:$4 sm:$0xff]   ;;  %v4600_v26 = vld [vmem:[%s6888_s1 + $0x130] ss:$8 sps:$4 sm:$0xff]  }
  0x1c   :  { %2950 = vmatpush1.bf16.msra.mxu0 %v4527_v27  ;;  %2573 = vmatprep.subr.bf16.mxu1 %v4528_v28  ;;  %v4587_v11 = vld [vmem:[%s6888_s1 + $0x704] ss:$8 sps:$4 sm:$0xff]   ;;  %v4585_v13 = vld [vmem:[%s6888_s1 + $0x700] ss:$8 sps:$4 sm:$0xff]   ;;  %v183_v15 = vpack.c.bf16 %v63_v10, %v39_v9  ;;  %v4603_v27 = vld [vmem:[%s6888_s1 + $0x730] ss:$8 sps:$4 sm:$0xff]  }
  0x1d   :  { %2951 = vmatprep.subr.bf16.mxu0 %v4530_v29  ;;  %v4596_v20 = vld [vmem:[%s6888_s1 + $0x124] ss:$8 sps:$4 sm:$0xff]   ;;  %v4594_v22 = vld [vmem:[%s6888_s1 + $0x120] ss:$8 sps:$4 sm:$0xff]   ;;  %v30_v6 = vld [vmem:[%s6887_s0 + $0x18] sm:$0xff] }
  0x1e   :  { %v4599_v21 = vld [vmem:[%s6888_s1 + $0x724] ss:$8 sps:$4 sm:$0xff]   ;;  %v4597_v23 = vld [vmem:[%s6888_s1 + $0x720] ss:$8 sps:$4 sm:$0xff]   ;;  %v42_v10 = vld [vmem:[%s6887_s0 + $0x78] sm:$0xff] }
  0x1f   :  { %2574 = vmatpush1.bf16.msra.mxu1 %v4532_v30  ;;  %v4608_v28 = vld [vmem:[%s6888_s1 + $0x144] ss:$8 sps:$4 sm:$0xff]   ;;  %v4618_v52 = vld [vmem:[%s6888_s1 + $0x160] ss:$8 sps:$4 sm:$0xff]  }
  0x20   :  { %2952 = vmatpush1.bf16.msra.mxu0 %v4533_v31  ;;  %2575 = vmatprep.subr.bf16.mxu1 %v4534_v32  ;;  %v4611_v29 = vld [vmem:[%s6888_s1 + $0x744] ss:$8 sps:$4 sm:$0xff]   ;;  %v4606_v32 = vld [vmem:[%s6888_s1 + $0x140] ss:$8 sps:$4 sm:$0xff]  }
  0x21   :  { %2953 = vmatprep.subr.bf16.mxu0 %v4536_v33  ;;  %v76_v30 = vld [vmem:[%s6887_s0 + $0x188] sm:$0xff] }
  0x22   :  { %v100_v31 = vld [vmem:[%s6887_s0 + $0x248] sm:$0xff] }
  0x23   :  { %2576 = vmatpush1.bf16.msra.mxu1 %v4538_v34  ;;  %v196_v33 = vpack.c.bf16 %v100_v31, %v76_v30  ;;  %v4609_v34 = vld [vmem:[%s6888_s1 + $0x740] ss:$8 sps:$4 sm:$0xff]   ;;  %v4620_v48 = vld [vmem:[%s6888_s1 + $0x164] ss:$8 sps:$4 sm:$0xff]   ;;  %v4662_v30 = vld [vmem:[%s6888_s1 + $0x1d4] ss:$8 sps:$4 sm:$0xff]  }
  0x24   :  { %2954 = vmatpush1.bf16.msra.mxu0 %v4539_v35  ;;  %2577 = vmatprep.subr.bf16.mxu1 %v4540_v36  ;;  %v88_v35 = vld [vmem:[%s6887_s0 + $0x1e8] sm:$0xff]  ;;  %v4665_v31 = vld [vmem:[%s6888_s1 + $0x7d4] ss:$8 sps:$4 sm:$0xff]  }
  0x25   :  { %2955 = vmatprep.subr.bf16.mxu0 %v4542_v37  ;;  %v112_v36 = vld [vmem:[%s6887_s0 + $0x2a8] sm:$0xff]  ;;  %v4614_v37 = vld [vmem:[%s6888_s1 + $0x154] ss:$8 sps:$4 sm:$0xff]  }
  0x26   :  { %v4623_v49 = vld [vmem:[%s6888_s1 + $0x764] ss:$8 sps:$4 sm:$0xff]   ;;  %v4621_v54 = vld [vmem:[%s6888_s1 + $0x760] ss:$8 sps:$4 sm:$0xff]  }
  0x27   :  { %2578 = vmatpush1.bf16.msra.mxu1 %v4544_v38  ;;  %v208_v38 = vpack.c.bf16 %v112_v36, %v88_v35  ;;  %v136_v55 = vld [vmem:[%s6887_s0 + $0x368] sm:$0xff] }
  0x28   :  { %2956 = vmatpush1.bf16.msra.mxu0 %v4545_v39  ;;  %2579 = vmatprep.subr.bf16.mxu1 %v4546_v40  ;;  %v4617_v39 = vld [vmem:[%s6888_s1 + $0x754] ss:$8 sps:$4 sm:$0xff]   ;;  %v75_v40 = vld [vmem:[%s6887_s0 + $0x180] sm:$0xff] }
  0x29   :  { %2957 = vmatprep.subr.bf16.mxu0 %v4548_v41  ;;  %v99_v41 = vld [vmem:[%s6887_s0 + $0x240] sm:$0xff] }
  0x2a   :  { %v4630_v9 = vld [vmem:[%s6888_s1 + $0x180] ss:$8 sps:$4 sm:$0xff]   ;;  %v4671_v35 = vld [vmem:[%s6888_s1 + $0x7e4] ss:$8 sps:$4 sm:$0xff]  }
  0x2b   :  { %2580 = vmatpush1.bf16.msra.mxu1 %v4550_v42  ;;  %v195_v42 = vpack.c.bf16 %v99_v41, %v75_v40  ;;  %v4666_v36 = vld [vmem:[%s6888_s1 + $0x1e0] ss:$8 sps:$4 sm:$0xff]   ;;  %v4672_v40 = vld [vmem:[%s6888_s1 + $0x1f0] ss:$8 sps:$4 sm:$0xff]  }
  0x2c   :  { %2958 = vmatpush1.bf16.msra.mxu0 %v4551_v43  ;;  %2581 = vmatprep.subr.bf16.mxu1 %v4552_v44  ;;  %v87_v43 = vld [vmem:[%s6887_s0 + $0x1e0] sm:$0xff]  ;;  %v4675_v41 = vld [vmem:[%s6888_s1 + $0x7f0] ss:$8 sps:$4 sm:$0xff]  }
  0x2d   :  { %2959 = vmatprep.subr.bf16.mxu0 %v4554_v45  ;;  %v111_v44 = vld [vmem:[%s6887_s0 + $0x2a0] sm:$0xff]  ;;  %v4612_v45 = vld [vmem:[%s6888_s1 + $0x150] ss:$8 sps:$4 sm:$0xff]  }
  0x2f   :  { %2582 = vmatpush1.bf16.msra.mxu1 %v4556_v46  ;;  %v4615_v46 = vld [vmem:[%s6888_s1 + $0x750] ss:$8 sps:$4 sm:$0xff]  }
  0x30   :  { %2960 = vmatpush1.bf16.msra.mxu0 %v4557_v47  ;;  %2583 = vmatprep.subr.bf16.mxu1 %v4558_v50  ;;  %v207_v47 = vpack.c.bf16 %v111_v44, %v87_v43  ;;  %v124_v50 = vld [vmem:[%s6887_s0 + $0x308] sm:$0xff]  ;;  %v53_v44 = vld [vmem:[%s6887_s0 + $0xd0] sm:$0xff] }
  0x31   :  { %2961 = vmatprep.subr.bf16.mxu0 %v4560_v51  ;;  %v148_v51 = vld [vmem:[%s6887_s0 + $0x3c8] sm:$0xff] }
  0x32   :  { %v220_v53 = vpack.c.bf16 %v148_v51, %v124_v50  ;;  %v4680_v43 = vld [vmem:[%s6888_s1 + $0x204] ss:$8 sps:$4 sm:$0xff]  }
  0x33   :  { %2584 = vmatpush1.bf16.msra.mxu1 %v4562_v56  ;;  %v160_v56 = vld [vmem:[%s6887_s0 + $0x428] sm:$0xff] }
  0x34   :  { %2962 = vmatpush1.bf16.msra.mxu0 %v4563_v57  ;;  %2585 = vmatprep.subr.bf16.mxu1 %v4564_v58  ;;  %v4626_v57 = vld [vmem:[%s6888_s1 + $0x174] ss:$8 sps:$4 sm:$0xff]   ;;  %v232_v58 = vpack.c.bf16 %v160_v56, %v136_v55  ;;  %v4684_v56 = vld [vmem:[%s6888_s1 + $0x210] ss:$8 sps:$4 sm:$0xff]  }
  0x35   :  { %2963 = vmatprep.subr.bf16.mxu0 %v4566_v59  ;;  %v4629_v59 = vld [vmem:[%s6888_s1 + $0x774] ss:$8 sps:$4 sm:$0xff]  }
  0x36   :  { %v4689_v55 = vld [vmem:[%s6888_s1 + $0x814] ss:$8 sps:$4 sm:$0xff]  }
  0x37   :  { %2586 = vmatpush1.bf16.msra.mxu1 %v4568_v60  ;;  %v123_v60 = vld [vmem:[%s6887_s0 + $0x300] sm:$0xff] }
  0x38   :  { %2964 = vmatpush1.bf16.msra.mxu0 %v4569_v61  ;;  %2587 = vmatprep.subr.bf16.mxu1 %v4570_v62  ;;  %v147_v61 = vld [vmem:[%s6887_s0 + $0x3c0] sm:$0xff] }
  0x39   :  { %2965 = vmatprep.subr.bf16.mxu0 %v4572_v63  ;;  %v219_v62 = vpack.c.bf16 %v147_v61, %v123_v60  ;;  %v135_v63 = vld [vmem:[%s6887_s0 + $0x360] sm:$0xff]  ;;  %v114_v60 = vld [vmem:[%s6887_s0 + $0x2b8] sm:$0xff] }
  0x3a   :  { %v4692_v61 = vld [vmem:[%s6888_s1 + $0x224] ss:$8 sps:$4 sm:$0xff]  }
  0x3b   :  { %2588 = vmatpush1.bf16.msra.mxu1 %v4574_v0  ;;  %v159_v0 = vld [vmem:[%s6887_s0 + $0x420] sm:$0xff] }
  0x3c   :  { %2966 = vmatpush1.bf16.msra.mxu0 %v4575_v1  ;;  %2589 = vmatprep.subr.bf16.mxu1 %v4576_v2  ;;  %v4624_v1 = vld [vmem:[%s6888_s1 + $0x170] ss:$8 sps:$4 sm:$0xff]  }
  0x3d   :  { %2967 = vmatprep.subr.bf16.mxu0 %v4578_v3  ;;  %v4627_v2 = vld [vmem:[%s6888_s1 + $0x770] ss:$8 sps:$4 sm:$0xff]   ;;  %v231_v3 = vpack.c.bf16 %v159_v0, %v135_v63 }
  0x3e   :  { %v77_v0 = vld [vmem:[%s6887_s0 + $0x190] sm:$0xff] }
  0x3f   :  { %2590 = vmatpush1.bf16.msra.mxu1 %v4580_v4  ;;  %v4632_v4 = vld [vmem:[%s6888_s1 + $0x184] ss:$8 sps:$4 sm:$0xff]  }
  0x40   :  { %2968 = vmatpush1.bf16.msra.mxu0 %v4581_v5  ;;  %2622 = vmatprep.subr.bf16.mxu1 %v4584_v7  ;;  %v4635_v5 = vld [vmem:[%s6888_s1 + $0x784] ss:$8 sps:$4 sm:$0xff]   ;;  %v54_v7 = vld [vmem:[%s6887_s0 + $0xd8] sm:$0xff] }
  0x41   :  { %3000 = vmatprep.subr.bf16.mxu0 %v4587_v11  ;;  %v174_v8 = vpack.c.bf16 %v54_v7, %v30_v6  ;;  %v66_v11 = vld [vmem:[%s6887_s0 + $0x138] sm:$0xff] }
  0x42   :  { %2592 = vmatmul.mubr.bf16.vlgmr.msra.gmra.mrb[0].mxu1 %v171_v14  ;;  %v4638_v14 = vld [vmem:[%s6888_s1 + $0x194] ss:$8 sps:$4 sm:$0xff]  }
  0x43   :  { %2970 = vmatmul.mubr.bf16.vlgmr.msra.gmra.mrb[0].mxu0 %v183_v15  ;;  %2623 = vmatpush1.bf16.msra.mxu1 %v4582_v12  ;;  %v4633_v12 = vld [vmem:[%s6888_s1 + $0x780] ss:$8 sps:$4 sm:$0xff]   ;;  %v4641_v15 = vld [vmem:[%s6888_s1 + $0x794] ss:$8 sps:$4 sm:$0xff]  }
  0x44   :  { %3001 = vmatpush1.bf16.msra.mxu0 %v4585_v13  ;;  %2624 = vmatprep.subr.bf16.mxu1 %v4590_v16  ;;  %v186_v13 = vpack.c.bf16 %v66_v11, %v42_v10  ;;  %v4636_v16 = vld [vmem:[%s6888_s1 + $0x190] ss:$8 sps:$4 sm:$0xff]   ;;  %v4698_v10 = vld [vmem:[%s6888_s1 + $0x234] ss:$8 sps:$4 sm:$0xff]  }
  0x45   :  { %3002 = vmatprep.subr.bf16.mxu0 %v4593_v17  ;;  %2601 = vmatprep.mubr.bf16.mxu1 %v196_v33  ;;  %v4639_v17 = vld [vmem:[%s6888_s1 + $0x790] ss:$8 sps:$4 sm:$0xff]   ;;  %v4701_v11 = vld [vmem:[%s6888_s1 + $0x834] ss:$8 sps:$4 sm:$0xff]  }
  0x46   :  { %2979 = vmatprep.mubr.bf16.mxu0 %v208_v38  ;;  %v4663_v33 = vld [vmem:[%s6888_s1 + $0x7d0] ss:$8 sps:$4 sm:$0xff]   ;;  %v4674_v38 = vld [vmem:[%s6888_s1 + $0x1f4] ss:$8 sps:$4 sm:$0xff]  }
  0x47   :  { %2625 = vmatpush1.bf16.msra.mxu1 %v4588_v18  ;;  %v4644_v18 = vld [vmem:[%s6888_s1 + $0x1a4] ss:$8 sps:$4 sm:$0xff]  }
  0x48   :  { %3003 = vmatpush1.bf16.msra.mxu0 %v4591_v19  ;;  %2626 = vmatprep.subr.bf16.mxu1 %v4596_v20  ;;  %v4647_v19 = vld [vmem:[%s6888_s1 + $0x7a4] ss:$8 sps:$4 sm:$0xff]   ;;  %v4642_v20 = vld [vmem:[%s6888_s1 + $0x1a0] ss:$8 sps:$4 sm:$0xff]  }
  0x49   :  { %3004 = vmatprep.subr.bf16.mxu0 %v4599_v21  ;;  %v4645_v21 = vld [vmem:[%s6888_s1 + $0x7a0] ss:$8 sps:$4 sm:$0xff]  }
  0x4a   :  { %2602 = vmatmul.mubr.bf16.gmra.mrb[4].mxu1 %v195_v42  ;;  %v29_v42 = vld [vmem:[%s6887_s0 + $0x10] sm:$0xff] }
  0x4b   :  { %2627 = vmatpush1.bf16.msra.mxu1 %v4594_v22  ;;  %2980 = vmatmul.mubr.bf16.gmra.mrb[4].mxu0 %v207_v47  ;;  %v4650_v22 = vld [vmem:[%s6888_s1 + $0x1b4] ss:$8 sps:$4 sm:$0xff]   ;;  %v4683_v47 = vld [vmem:[%s6888_s1 + $0x804] ss:$8 sps:$4 sm:$0xff]   ;;  %v173_v50 = vpack.c.bf16 %v53_v44, %v29_v42  ;;  %v4720_v44 = vld [vmem:[%s6888_s1 + $0x270] ss:$8 sps:$4 sm:$0xff]  }
  0x4c   :  { %3005 = vmatpush1.bf16.msra.mxu0 %v4597_v23  ;;  %2628 = vmatprep.subr.bf16.mxu1 %v4602_v24  ;;  %v4653_v23 = vld [vmem:[%s6888_s1 + $0x7b4] ss:$8 sps:$4 sm:$0xff]   ;;  %v4648_v24 = vld [vmem:[%s6888_s1 + $0x1b0] ss:$8 sps:$4 sm:$0xff]  }
  0x4d   :  { %3006 = vmatprep.subr.bf16.mxu0 %v4605_v25  ;;  %2611 = vmatprep.mubr.bf16.mxu1 %v220_v53  ;;  %v4651_v25 = vld [vmem:[%s6888_s1 + $0x7b0] ss:$8 sps:$4 sm:$0xff]   ;;  %v4722_v42 = vld [vmem:[%s6888_s1 + $0x274] ss:$8 sps:$4 sm:$0xff]  }
  0x4e   :  { %2989 = vmatprep.mubr.bf16.mxu0 %v232_v58  ;;  %v102_v53 = vld [vmem:[%s6887_s0 + $0x258] sm:$0xff] }
  0x4f   :  { %2629 = vmatpush1.bf16.msra.mxu1 %v4600_v26  ;;  %v4656_v26 = vld [vmem:[%s6888_s1 + $0x1c4] ss:$8 sps:$4 sm:$0xff]  }
  0x50   :  { %3007 = vmatpush1.bf16.msra.mxu0 %v4603_v27  ;;  %2630 = vmatprep.subr.bf16.mxu1 %v4608_v28  ;;  %v4659_v27 = vld [vmem:[%s6888_s1 + $0x7c4] ss:$8 sps:$4 sm:$0xff]   ;;  %v4654_v28 = vld [vmem:[%s6888_s1 + $0x1c0] ss:$8 sps:$4 sm:$0xff]  }
  0x51   :  { %3008 = vmatprep.subr.bf16.mxu0 %v4611_v29  ;;  %v4657_v29 = vld [vmem:[%s6888_s1 + $0x7c0] ss:$8 sps:$4 sm:$0xff]  }
  0x52   :  { %2612 = vmatmul.mubr.bf16.gmra.mrb[8].mxu1 %v219_v62  ;;  %v4695_v62 = vld [vmem:[%s6888_s1 + $0x824] ss:$8 sps:$4 sm:$0xff]  }
  0x53   :  { %2631 = vmatpush1.bf16.msra.mxu1 %v4606_v32  ;;  %2990 = vmatmul.mubr.bf16.gmra.mrb[8].mxu0 %v231_v3  ;;  %v4660_v32 = vld [vmem:[%s6888_s1 + $0x1d0] ss:$8 sps:$4 sm:$0xff]  }
  0x54   :  { %3009 = vmatpush1.bf16.msra.mxu0 %v4609_v34  ;;  %2632 = vmatprep.subr.bf16.mxu1 %v4614_v37  ;;  %v4668_v34 = vld [vmem:[%s6888_s1 + $0x1e4] ss:$8 sps:$4 sm:$0xff]   ;;  %v4669_v37 = vld [vmem:[%s6888_s1 + $0x7e0] ss:$8 sps:$4 sm:$0xff]   ;;  %v113_v3 = vld [vmem:[%s6887_s0 + $0x2b0] sm:$0xff] }
  0x55   :  { %3010 = vmatprep.subr.bf16.mxu0 %v4617_v39  ;;  %2654 = vmatprep.mubr.bf16.mxu1 %v174_v8  ;;  %v4677_v39 = vld [vmem:[%s6888_s1 + $0x7f4] ss:$8 sps:$4 sm:$0xff]  }
  0x56   :  { %3032 = vmatprep.mubr.bf16.mxu0 %v186_v13  ;;  %v126_v8 = vld [vmem:[%s6887_s0 + $0x318] sm:$0xff] }
  0x57   :  { %2633 = vmatpush1.bf16.msra.mxu1 %v4612_v45  ;;  %v41_v45 = vld [vmem:[%s6887_s0 + $0x70] sm:$0xff] }
  0x58   :  { %3011 = vmatpush1.bf16.msra.mxu0 %v4615_v46  ;;  %2634 = vmatprep.subr.bf16.mxu1 %v4620_v48  ;;  %v65_v46 = vld [vmem:[%s6887_s0 + $0x130] sm:$0xff]  ;;  %v4678_v48 = vld [vmem:[%s6888_s1 + $0x200] ss:$8 sps:$4 sm:$0xff]  }
  0x59   :  { %3012 = vmatprep.subr.bf16.mxu0 %v4623_v49  ;;  %v4681_v49 = vld [vmem:[%s6888_s1 + $0x800] ss:$8 sps:$4 sm:$0xff]   ;;  %v185_v51 = vpack.c.bf16 %v65_v46, %v41_v45  ;;  %v4699_v13 = vld [vmem:[%s6888_s1 + $0x830] ss:$8 sps:$4 sm:$0xff]   ;;  %v4728_v46 = vld [vmem:[%s6888_s1 + $0x284] ss:$8 sps:$4 sm:$0xff]  }
  0x5a   :  { %v4723_v45 = vld [vmem:[%s6888_s1 + $0x870] ss:$8 sps:$4 sm:$0xff]  }
  0x5b   :  { %2635 = vmatpush1.bf16.msra.mxu1 %v4618_v52  ;;  %v78_v52 = vld [vmem:[%s6887_s0 + $0x198] sm:$0xff] }
  0x5c   :  { %3013 = vmatpush1.bf16.msra.mxu0 %v4621_v54  ;;  %2636 = vmatprep.subr.bf16.mxu1 %v4626_v57  ;;  %v4686_v54 = vld [vmem:[%s6888_s1 + $0x214] ss:$8 sps:$4 sm:$0xff]   ;;  %v4687_v57 = vld [vmem:[%s6888_s1 + $0x810] ss:$8 sps:$4 sm:$0xff]   ;;  %v198_v58 = vpack.c.bf16 %v102_v53, %v78_v52 }
  0x5d   :  { %3014 = vmatprep.subr.bf16.mxu0 %v4629_v59  ;;  %v90_v59 = vld [vmem:[%s6887_s0 + $0x1f8] sm:$0xff] }
  0x5e   :  { %v210_v63 = vpack.c.bf16 %v114_v60, %v90_v59  ;;  %v4732_v52 = vld [vmem:[%s6888_s1 + $0x290] ss:$8 sps:$4 sm:$0xff]   ;;  %v4749_v59 = vld [vmem:[%s6888_s1 + $0x8b4] ss:$8 sps:$4 sm:$0xff]  }
  0x5f   :  { %2637 = vmatpush1.bf16.msra.mxu1 %v4624_v1  ;;  %v101_v1 = vld [vmem:[%s6887_s0 + $0x250] sm:$0xff] }
  0x60   :  { %3015 = vmatpush1.bf16.msra.mxu0 %v4627_v2  ;;  %2638 = vmatprep.subr.bf16.mxu1 %v4632_v4  ;;  %v89_v2 = vld [vmem:[%s6887_s0 + $0x1f0] sm:$0xff]  ;;  %v4690_v4 = vld [vmem:[%s6888_s1 + $0x220] ss:$8 sps:$4 sm:$0xff]   ;;  %v197_v6 = vpack.c.bf16 %v101_v1, %v77_v0 }
  0x61   :  { %3016 = vmatprep.subr.bf16.mxu0 %v4635_v5  ;;  %v4693_v5 = vld [vmem:[%s6888_s1 + $0x820] ss:$8 sps:$4 sm:$0xff]   ;;  %v209_v7 = vpack.c.bf16 %v113_v3, %v89_v2  ;;  %v4735_v53 = vld [vmem:[%s6888_s1 + $0x890] ss:$8 sps:$4 sm:$0xff]   ;;  %v4758_v2 = vld [vmem:[%s6888_s1 + $0x2d4] ss:$8 sps:$4 sm:$0xff]  }
  0x62   :  { %v4744_v60 = vld [vmem:[%s6888_s1 + $0x2b0] ss:$8 sps:$4 sm:$0xff]   ;;  %v4750_v0 = vld [vmem:[%s6888_s1 + $0x2c0] ss:$8 sps:$4 sm:$0xff]   ;;  %v4761_v3 = vld [vmem:[%s6888_s1 + $0x8d4] ss:$8 sps:$4 sm:$0xff]  }
  0x63   :  { %2639 = vmatpush1.bf16.msra.mxu1 %v4630_v9  ;;  %v150_v9 = vld [vmem:[%s6887_s0 + $0x3d8] sm:$0xff]  ;;  %v4753_v1 = vld [vmem:[%s6888_s1 + $0x8c0] ss:$8 sps:$4 sm:$0xff]  }
  0x64   :  { %3017 = vmatpush1.bf16.msra.mxu0 %v4633_v12  ;;  %2640 = vmatprep.subr.bf16.mxu1 %v4638_v14  ;;  %v4696_v12 = vld [vmem:[%s6888_s1 + $0x230] ss:$8 sps:$4 sm:$0xff]   ;;  %v222_v14 = vpack.c.bf16 %v150_v9, %v126_v8  ;;  %v4762_v8 = vld [vmem:[%s6888_s1 + $0x2e0] ss:$8 sps:$4 sm:$0xff]  }
  0x65   :  { %3018 = vmatprep.subr.bf16.mxu0 %v4641_v15  ;;  %v138_v15 = vld [vmem:[%s6887_s0 + $0x378] sm:$0xff]  ;;  %v4765_v9 = vld [vmem:[%s6888_s1 + $0x8e0] ss:$8 sps:$4 sm:$0xff]  }
  0x67   :  { %2641 = vmatpush1.bf16.msra.mxu1 %v4636_v16  ;;  %v162_v16 = vld [vmem:[%s6887_s0 + $0x438] sm:$0xff] }
  0x68   :  { %3019 = vmatpush1.bf16.msra.mxu0 %v4639_v17  ;;  %2642 = vmatprep.subr.bf16.mxu1 %v4644_v18  ;;  %v4704_v17 = vld [vmem:[%s6888_s1 + $0x244] ss:$8 sps:$4 sm:$0xff]  }
  0x69   :  { %3020 = vmatprep.subr.bf16.mxu0 %v4647_v19  ;;  %v4707_v18 = vld [vmem:[%s6888_s1 + $0x844] ss:$8 sps:$4 sm:$0xff]   ;;  %v234_v19 = vpack.c.bf16 %v162_v16, %v138_v15 }
  0x6a   :  { %v31_v15 = vld [vmem:[%s6887_s0 + $0x20] sm:$0xff] }
  0x6b   :  { %2643 = vmatpush1.bf16.msra.mxu1 %v4642_v20  ;;  %v125_v20 = vld [vmem:[%s6887_s0 + $0x310] sm:$0xff]  ;;  %v55_v16 = vld [vmem:[%s6887_s0 + $0xe0] sm:$0xff] }
  0x6c   :  { %3021 = vmatpush1.bf16.msra.mxu0 %v4645_v21  ;;  %2644 = vmatprep.subr.bf16.mxu1 %v4650_v22  ;;  %v149_v21 = vld [vmem:[%s6887_s0 + $0x3d0] sm:$0xff] }
  0x6d   :  { %3022 = vmatprep.subr.bf16.mxu0 %v4653_v23  ;;  %v137_v22 = vld [vmem:[%s6887_s0 + $0x370] sm:$0xff] }
  0x6e   :  { %v161_v23 = vld [vmem:[%s6887_s0 + $0x430] sm:$0xff] }
  0x6f   :  { %2645 = vmatpush1.bf16.msra.mxu1 %v4648_v24  ;;  %v4702_v24 = vld [vmem:[%s6888_s1 + $0x240] ss:$8 sps:$4 sm:$0xff]  }
  0x70   :  { %3023 = vmatpush1.bf16.msra.mxu0 %v4651_v25  ;;  %2646 = vmatprep.subr.bf16.mxu1 %v4656_v26  ;;  %v4705_v25 = vld [vmem:[%s6888_s1 + $0x840] ss:$8 sps:$4 sm:$0xff]   ;;  %v221_v26 = vpack.c.bf16 %v149_v21, %v125_v20 }
  0x71   :  { %3024 = vmatprep.subr.bf16.mxu0 %v4659_v27  ;;  %v233_v27 = vpack.c.bf16 %v161_v23, %v137_v22  ;;  %v4774_v20 = vld [vmem:[%s6888_s1 + $0x300] ss:$8 sps:$4 sm:$0xff]   ;;  %v175_v23 = vpack.c.bf16 %v55_v16, %v31_v15  ;;  %v4821_v15 = vld [vmem:[%s6888_s1 + $0x974] ss:$8 sps:$4 sm:$0xff]   ;;  %v4816_v16 = vld [vmem:[%s6888_s1 + $0x370] ss:$8 sps:$4 sm:$0xff]  }
  0x72   :  { %v4777_v21 = vld [vmem:[%s6888_s1 + $0x900] ss:$8 sps:$4 sm:$0xff]  }
  0x73   :  { %2647 = vmatpush1.bf16.msra.mxu1 %v4654_v28  ;;  %v32_v28 = vld [vmem:[%s6887_s0 + $0x28] sm:$0xff] }
  0x74   :  { %3025 = vmatpush1.bf16.msra.mxu0 %v4657_v29  ;;  %2648 = vmatprep.subr.bf16.mxu1 %v4662_v30  ;;  %v56_v29 = vld [vmem:[%s6887_s0 + $0xe8] sm:$0xff]  ;;  %v4710_v30 = vld [vmem:[%s6888_s1 + $0x254] ss:$8 sps:$4 sm:$0xff]  }
  0x75   :  { %3026 = vmatprep.subr.bf16.mxu0 %v4665_v31  ;;  %v4713_v31 = vld [vmem:[%s6888_s1 + $0x854] ss:$8 sps:$4 sm:$0xff]   ;;  %v80_v22 = vld [vmem:[%s6887_s0 + $0x1a8] sm:$0xff] }
  0x77   :  { %2649 = vmatpush1.bf16.msra.mxu1 %v4660_v32  ;;  %v176_v32 = vpack.c.bf16 %v56_v29, %v32_v28  ;;  %v4782_v28 = vld [vmem:[%s6888_s1 + $0x314] ss:$8 sps:$4 sm:$0xff]  }
  0x78   :  { %3027 = vmatpush1.bf16.msra.mxu0 %v4663_v33  ;;  %2650 = vmatprep.subr.bf16.mxu1 %v4668_v34  ;;  %v44_v33 = vld [vmem:[%s6887_s0 + $0x88] sm:$0xff]  ;;  %v4785_v29 = vld [vmem:[%s6888_s1 + $0x914] ss:$8 sps:$4 sm:$0xff]  }
  0x79   :  { %3028 = vmatprep.subr.bf16.mxu0 %v4671_v35  ;;  %v68_v34 = vld [vmem:[%s6887_s0 + $0x148] sm:$0xff] }
  0x7a   :  { %v188_v35 = vpack.c.bf16 %v68_v34, %v44_v33  ;;  %v4788_v34 = vld [vmem:[%s6888_s1 + $0x324] ss:$8 sps:$4 sm:$0xff]  }
  0x7b   :  { %2651 = vmatpush1.bf16.msra.mxu1 %v4666_v36  ;;  %v4708_v36 = vld [vmem:[%s6888_s1 + $0x250] ss:$8 sps:$4 sm:$0xff]  }
  0x7c   :  { %3029 = vmatpush1.bf16.msra.mxu0 %v4669_v37  ;;  %2652 = vmatprep.subr.bf16.mxu1 %v4674_v38  ;;  %v4711_v37 = vld [vmem:[%s6888_s1 + $0x850] ss:$8 sps:$4 sm:$0xff]   ;;  %v4716_v38 = vld [vmem:[%s6888_s1 + $0x264] ss:$8 sps:$4 sm:$0xff]  }
  0x7d   :  { %3030 = vmatprep.subr.bf16.mxu0 %v4677_v39  ;;  %v4719_v39 = vld [vmem:[%s6888_s1 + $0x864] ss:$8 sps:$4 sm:$0xff]  }
  0x7f   :  { %2653 = vmatpush1.bf16.msra.mxu1 %v4672_v40  ;;  %v4714_v40 = vld [vmem:[%s6888_s1 + $0x260] ss:$8 sps:$4 sm:$0xff]  }
  0x80   :  { %3031 = vmatpush1.bf16.msra.mxu0 %v4675_v41  ;;  %2685 = vmatprep.subr.bf16.mxu1 %v4680_v43  ;;  %v4717_v41 = vld [vmem:[%s6888_s1 + $0x860] ss:$8 sps:$4 sm:$0xff]   ;;  %v4725_v43 = vld [vmem:[%s6888_s1 + $0x874] ss:$8 sps:$4 sm:$0xff]  }
  0x81   :  { %3063 = vmatprep.subr.bf16.mxu0 %v4683_v47  ;;  %v4731_v47 = vld [vmem:[%s6888_s1 + $0x884] ss:$8 sps:$4 sm:$0xff]  }
  0x82   :  { %2655 = vmatmul.mubr.bf16.vlgmr.msra.gmra.mrb[0].mxu1 %v173_v50  ;;  %v4734_v50 = vld [vmem:[%s6888_s1 + $0x294] ss:$8 sps:$4 sm:$0xff]  }
  0x83   :  { %3033 = vmatmul.mubr.bf16.vlgmr.msra.gmra.mrb[0].mxu0 %v185_v51  ;;  %2686 = vmatpush1.bf16.msra.mxu1 %v4678_v48  ;;  %v4726_v48 = vld [vmem:[%s6888_s1 + $0x280] ss:$8 sps:$4 sm:$0xff]   ;;  %v4737_v51 = vld [vmem:[%s6888_s1 + $0x894] ss:$8 sps:$4 sm:$0xff]  }
  0x84   :  { %3064 = vmatpush1.bf16.msra.mxu0 %v4681_v49  ;;  %2687 = vmatprep.subr.bf16.mxu1 %v4686_v54  ;;  %v4729_v49 = vld [vmem:[%s6888_s1 + $0x880] ss:$8 sps:$4 sm:$0xff]   ;;  %v4740_v54 = vld [vmem:[%s6888_s1 + $0x2a4] ss:$8 sps:$4 sm:$0xff]  }
  0x85   :  { %3065 = vmatprep.subr.bf16.mxu0 %v4689_v55  ;;  %2664 = vmatprep.mubr.bf16.mxu1 %v198_v58  ;;  %v4743_v55 = vld [vmem:[%s6888_s1 + $0x8a4] ss:$8 sps:$4 sm:$0xff]   ;;  %v4746_v58 = vld [vmem:[%s6888_s1 + $0x2b4] ss:$8 sps:$4 sm:$0xff]  }
  0x86   :  { %3042 = vmatprep.mubr.bf16.mxu0 %v210_v63  ;;  %v4755_v63 = vld [vmem:[%s6888_s1 + $0x8c4] ss:$8 sps:$4 sm:$0xff]  }
  0x87   :  { %2688 = vmatpush1.bf16.msra.mxu1 %v4684_v56  ;;  %v4738_v56 = vld [vmem:[%s6888_s1 + $0x2a0] ss:$8 sps:$4 sm:$0xff]  }
  0x88   :  { %3066 = vmatpush1.bf16.msra.mxu0 %v4687_v57  ;;  %2689 = vmatprep.subr.bf16.mxu1 %v4692_v61  ;;  %v4741_v57 = vld [vmem:[%s6888_s1 + $0x8a0] ss:$8 sps:$4 sm:$0xff]   ;;  %v4747_v61 = vld [vmem:[%s6888_s1 + $0x8b0] ss:$8 sps:$4 sm:$0xff]  }
  0x89   :  { %3067 = vmatprep.subr.bf16.mxu0 %v4695_v62  ;;  %v4752_v62 = vld [vmem:[%s6888_s1 + $0x2c4] ss:$8 sps:$4 sm:$0xff]  }
  0x8a   :  { %2665 = vmatmul.mubr.bf16.gmra.mrb[4].mxu1 %v197_v6  ;;  %v4764_v6 = vld [vmem:[%s6888_s1 + $0x2e4] ss:$8 sps:$4 sm:$0xff]  }
  0x8b   :  { %3043 = vmatmul.mubr.bf16.gmra.mrb[4].mxu0 %v209_v7  ;;  %2690 = vmatpush1.bf16.msra.mxu1 %v4690_v4  ;;  %v4756_v4 = vld [vmem:[%s6888_s1 + $0x2d0] ss:$8 sps:$4 sm:$0xff]   ;;  %v4767_v7 = vld [vmem:[%s6888_s1 + $0x8e4] ss:$8 sps:$4 sm:$0xff]  }
  0x8c   :  { %3068 = vmatpush1.bf16.msra.mxu0 %v4693_v5  ;;  %2691 = vmatprep.subr.bf16.mxu1 %v4698_v10  ;;  %v4759_v5 = vld [vmem:[%s6888_s1 + $0x8d0] ss:$8 sps:$4 sm:$0xff]   ;;  %v4770_v10 = vld [vmem:[%s6888_s1 + $0x2f4] ss:$8 sps:$4 sm:$0xff]  }
  0x8d   :  { %3069 = vmatprep.subr.bf16.mxu0 %v4701_v11  ;;  %2674 = vmatprep.mubr.bf16.mxu1 %v222_v14  ;;  %v4773_v11 = vld [vmem:[%s6888_s1 + $0x8f4] ss:$8 sps:$4 sm:$0xff]   ;;  %v4776_v14 = vld [vmem:[%s6888_s1 + $0x304] ss:$8 sps:$4 sm:$0xff]  }
  0x8e   :  { %3052 = vmatprep.mubr.bf16.mxu0 %v234_v19  ;;  %v4779_v19 = vld [vmem:[%s6888_s1 + $0x904] ss:$8 sps:$4 sm:$0xff]  }
  0x8f   :  { %2692 = vmatpush1.bf16.msra.mxu1 %v4696_v12  ;;  %v4768_v12 = vld [vmem:[%s6888_s1 + $0x2f0] ss:$8 sps:$4 sm:$0xff]  }
  0x90   :  { %3070 = vmatpush1.bf16.msra.mxu0 %v4699_v13  ;;  %2693 = vmatprep.subr.bf16.mxu1 %v4704_v17  ;;  %v4771_v13 = vld [vmem:[%s6888_s1 + $0x8f0] ss:$8 sps:$4 sm:$0xff]   ;;  %v43_v17 = vld [vmem:[%s6887_s0 + $0x80] sm:$0xff] }
  0x91   :  { %3071 = vmatprep.subr.bf16.mxu0 %v4707_v18  ;;  %v67_v18 = vld [vmem:[%s6887_s0 + $0x140] sm:$0xff] }
  0x92   :  { %2675 = vmatmul.mubr.bf16.gmra.mrb[8].mxu1 %v221_v26  ;;  %v92_v26 = vld [vmem:[%s6887_s0 + $0x208] sm:$0xff] }
  0x93   :  { %3053 = vmatmul.mubr.bf16.gmra.mrb[8].mxu0 %v233_v27  ;;  %2694 = vmatpush1.bf16.msra.mxu1 %v4702_v24  ;;  %v187_v24 = vpack.c.bf16 %v67_v18, %v43_v17  ;;  %v116_v27 = vld [vmem:[%s6887_s0 + $0x2c8] sm:$0xff]  ;;  %v4819_v17 = vld [vmem:[%s6888_s1 + $0x970] ss:$8 sps:$4 sm:$0xff]  }
  0x94   :  { %3072 = vmatpush1.bf16.msra.mxu0 %v4705_v25  ;;  %2695 = vmatprep.subr.bf16.mxu1 %v4710_v30  ;;  %v104_v25 = vld [vmem:[%s6887_s0 + $0x268] sm:$0xff]  ;;  %v4780_v30 = vld [vmem:[%s6888_s1 + $0x310] ss:$8 sps:$4 sm:$0xff]   ;;  %v212_v33 = vpack.c.bf16 %v116_v27, %v92_v26 }
  0x95   :  { %3073 = vmatprep.subr.bf16.mxu0 %v4713_v31  ;;  %2717 = vmatprep.mubr.bf16.mxu1 %v176_v32  ;;  %v4783_v31 = vld [vmem:[%s6888_s1 + $0x910] ss:$8 sps:$4 sm:$0xff]   ;;  %v200_v32 = vpack.c.bf16 %v104_v25, %v80_v22  ;;  %v4824_v18 = vld [vmem:[%s6888_s1 + $0x384] ss:$8 sps:$4 sm:$0xff]   ;;  %v4830_v22 = vld [vmem:[%s6888_s1 + $0x394] ss:$8 sps:$4 sm:$0xff]  }
  0x96   :  { %3095 = vmatprep.mubr.bf16.mxu0 %v188_v35  ;;  %v79_v35 = vld [vmem:[%s6887_s0 + $0x1a0] sm:$0xff]  ;;  %v4831_v25 = vld [vmem:[%s6888_s1 + $0x990] ss:$8 sps:$4 sm:$0xff]  }
  0x97   :  { %2696 = vmatpush1.bf16.msra.mxu1 %v4708_v36  ;;  %v103_v36 = vld [vmem:[%s6887_s0 + $0x260] sm:$0xff] }
  0x98   :  { %3074 = vmatpush1.bf16.msra.mxu0 %v4711_v37  ;;  %2697 = vmatprep.subr.bf16.mxu1 %v4716_v38  ;;  %v91_v37 = vld [vmem:[%s6887_s0 + $0x200] sm:$0xff] }
  0x99   :  { %3075 = vmatprep.subr.bf16.mxu0 %v4719_v39  ;;  %v115_v38 = vld [vmem:[%s6887_s0 + $0x2c0] sm:$0xff] }
  0x9a   :  { %v4791_v39 = vld [vmem:[%s6888_s1 + $0x924] ss:$8 sps:$4 sm:$0xff]  }
  0x9b   :  { %2698 = vmatpush1.bf16.msra.mxu1 %v4714_v40  ;;  %v4786_v40 = vld [vmem:[%s6888_s1 + $0x320] ss:$8 sps:$4 sm:$0xff]   ;;  %v4836_v26 = vld [vmem:[%s6888_s1 + $0x3a4] ss:$8 sps:$4 sm:$0xff]  }
  0x9c   :  { %3076 = vmatpush1.bf16.msra.mxu0 %v4717_v41  ;;  %2699 = vmatprep.subr.bf16.mxu1 %v4722_v42  ;;  %v4789_v41 = vld [vmem:[%s6888_s1 + $0x920] ss:$8 sps:$4 sm:$0xff]   ;;  %v4839_v27 = vld [vmem:[%s6888_s1 + $0x9a4] ss:$8 sps:$4 sm:$0xff]  }
  0x9d   :  { %3077 = vmatprep.subr.bf16.mxu0 %v4725_v43  ;;  %v128_v42 = vld [vmem:[%s6887_s0 + $0x328] sm:$0xff]  ;;  %v199_v43 = vpack.c.bf16 %v103_v36, %v79_v35 }
  0x9e   :  { %v4851_v35 = vld [vmem:[%s6888_s1 + $0x9c4] ss:$8 sps:$4 sm:$0xff]   ;;  %v4846_v36 = vld [vmem:[%s6888_s1 + $0x3c0] ss:$8 sps:$4 sm:$0xff]  }
  0x9f   :  { %2700 = vmatpush1.bf16.msra.mxu1 %v4720_v44  ;;  %v211_v44 = vpack.c.bf16 %v115_v38, %v91_v37  ;;  %v4849_v37 = vld [vmem:[%s6888_s1 + $0x9c0] ss:$8 sps:$4 sm:$0xff]   ;;  %v4854_v38 = vld [vmem:[%s6888_s1 + $0x3d4] ss:$8 sps:$4 sm:$0xff]  }
  0xa0   :  { %3078 = vmatpush1.bf16.msra.mxu0 %v4723_v45  ;;  %2701 = vmatprep.subr.bf16.mxu1 %v4728_v46  ;;  %v152_v45 = vld [vmem:[%s6887_s0 + $0x3e8] sm:$0xff] }
  0xa1   :  { %3079 = vmatprep.subr.bf16.mxu0 %v4731_v47  ;;  %v140_v46 = vld [vmem:[%s6887_s0 + $0x388] sm:$0xff] }
  0xa2   :  { %v164_v47 = vld [vmem:[%s6887_s0 + $0x448] sm:$0xff] }
  0xa3   :  { %2702 = vmatpush1.bf16.msra.mxu1 %v4726_v48  ;;  %v4794_v48 = vld [vmem:[%s6888_s1 + $0x334] ss:$8 sps:$4 sm:$0xff]  }
  0xa4   :  { %3080 = vmatpush1.bf16.msra.mxu0 %v4729_v49  ;;  %2703 = vmatprep.subr.bf16.mxu1 %v4734_v50  ;;  %v4797_v49 = vld [vmem:[%s6888_s1 + $0x934] ss:$8 sps:$4 sm:$0xff]   ;;  %v4792_v50 = vld [vmem:[%s6888_s1 + $0x330] ss:$8 sps:$4 sm:$0xff]  }
  0xa5   :  { %3081 = vmatprep.subr.bf16.mxu0 %v4737_v51  ;;  %v4795_v51 = vld [vmem:[%s6888_s1 + $0x930] ss:$8 sps:$4 sm:$0xff]  }
  0xa7   :  { %2704 = vmatpush1.bf16.msra.mxu1 %v4732_v52  ;;  %v224_v52 = vpack.c.bf16 %v152_v45, %v128_v42  ;;  %v4860_v42 = vld [vmem:[%s6888_s1 + $0x3e4] ss:$8 sps:$4 sm:$0xff]   ;;  %v4861_v45 = vld [vmem:[%s6888_s1 + $0x9e0] ss:$8 sps:$4 sm:$0xff]  }
  0xa8   :  { %3082 = vmatpush1.bf16.msra.mxu0 %v4735_v53  ;;  %2705 = vmatprep.subr.bf16.mxu1 %v4740_v54  ;;  %v236_v53 = vpack.c.bf16 %v164_v47, %v140_v46  ;;  %v127_v54 = vld [vmem:[%s6887_s0 + $0x320] sm:$0xff]  ;;  %v4866_v46 = vld [vmem:[%s6888_s1 + $0x3f4] ss:$8 sps:$4 sm:$0xff]  }
  0xa9   :  { %3083 = vmatprep.subr.bf16.mxu0 %v4743_v55  ;;  %v4800_v55 = vld [vmem:[%s6888_s1 + $0x344] ss:$8 sps:$4 sm:$0xff]   ;;  %v4869_v47 = vld [vmem:[%s6888_s1 + $0x9f4] ss:$8 sps:$4 sm:$0xff]  }
  0xab   :  { %2706 = vmatpush1.bf16.msra.mxu1 %v4738_v56  ;;  %v151_v56 = vld [vmem:[%s6887_s0 + $0x3e0] sm:$0xff] }
  0xac   :  { %3084 = vmatpush1.bf16.msra.mxu0 %v4741_v57  ;;  %2707 = vmatprep.subr.bf16.mxu1 %v4746_v58  ;;  %v139_v57 = vld [vmem:[%s6887_s0 + $0x380] sm:$0xff] }
  0xad   :  { %3085 = vmatprep.subr.bf16.mxu0 %v4749_v59  ;;  %v163_v58 = vld [vmem:[%s6887_s0 + $0x440] sm:$0xff] }
  0xae   :  { %v4803_v59 = vld [vmem:[%s6888_s1 + $0x944] ss:$8 sps:$4 sm:$0xff]  }
  0xaf   :  { %2708 = vmatpush1.bf16.msra.mxu1 %v4744_v60  ;;  %v4798_v60 = vld [vmem:[%s6888_s1 + $0x340] ss:$8 sps:$4 sm:$0xff]  }
  0xb0   :  { %3086 = vmatpush1.bf16.msra.mxu0 %v4747_v61  ;;  %2709 = vmatprep.subr.bf16.mxu1 %v4752_v62  ;;  %v4801_v61 = vld [vmem:[%s6888_s1 + $0x940] ss:$8 sps:$4 sm:$0xff]   ;;  %v34_v62 = vld [vmem:[%s6887_s0 + $0x38] sm:$0xff] }
  0xb1   :  { %3087 = vmatprep.subr.bf16.mxu0 %v4755_v63  ;;  %v58_v63 = vld [vmem:[%s6887_s0 + $0xf8] sm:$0xff] }
  0xb3   :  { %2710 = vmatpush1.bf16.msra.mxu1 %v4750_v0  ;;  %v223_v0 = vpack.c.bf16 %v151_v56, %v127_v54  ;;  %v69_v54 = vld [vmem:[%s6887_s0 + $0x150] sm:$0xff]  ;;  %v4870_v56 = vld [vmem:[%s6888_s1 + $0x400] ss:$8 sps:$4 sm:$0xff]  }
  0xb4   :  { %3088 = vmatpush1.bf16.msra.mxu0 %v4753_v1  ;;  %2711 = vmatprep.subr.bf16.mxu1 %v4758_v2  ;;  %v235_v1 = vpack.c.bf16 %v163_v58, %v139_v57  ;;  %v46_v2 = vld [vmem:[%s6887_s0 + $0x98] sm:$0xff]  ;;  %v4873_v57 = vld [vmem:[%s6888_s1 + $0xa00] ss:$8 sps:$4 sm:$0xff]  }
  0xb5   :  { %3089 = vmatprep.subr.bf16.mxu0 %v4761_v3  ;;  %v70_v3 = vld [vmem:[%s6887_s0 + $0x158] sm:$0xff] }
  0xb6   :  { %v82_v58 = vld [vmem:[%s6887_s0 + $0x1b8] sm:$0xff] }
  0xb7   :  { %2712 = vmatpush1.bf16.msra.mxu1 %v4756_v4  ;;  %v4806_v4 = vld [vmem:[%s6888_s1 + $0x354] ss:$8 sps:$4 sm:$0xff]  }
  0xb8   :  { %3090 = vmatpush1.bf16.msra.mxu0 %v4759_v5  ;;  %2713 = vmatprep.subr.bf16.mxu1 %v4764_v6  ;;  %v4809_v5 = vld [vmem:[%s6888_s1 + $0x954] ss:$8 sps:$4 sm:$0xff]   ;;  %v178_v6 = vpack.c.bf16 %v58_v63, %v34_v62 }
  0xb9   :  { %3091 = vmatprep.subr.bf16.mxu0 %v4767_v7  ;;  %v190_v7 = vpack.c.bf16 %v70_v3, %v46_v2  ;;  %v94_v62 = vld [vmem:[%s6887_s0 + $0x218] sm:$0xff] }
  0xba   :  { %v118_v63 = vld [vmem:[%s6887_s0 + $0x2d8] sm:$0xff] }
  0xbb   :  { %2714 = vmatpush1.bf16.msra.mxu1 %v4762_v8  ;;  %v4804_v8 = vld [vmem:[%s6888_s1 + $0x350] ss:$8 sps:$4 sm:$0xff]  }
  0xbc   :  { %3092 = vmatpush1.bf16.msra.mxu0 %v4765_v9  ;;  %2715 = vmatprep.subr.bf16.mxu1 %v4770_v10  ;;  %v4807_v9 = vld [vmem:[%s6888_s1 + $0x950] ss:$8 sps:$4 sm:$0xff]   ;;  %v4812_v10 = vld [vmem:[%s6888_s1 + $0x364] ss:$8 sps:$4 sm:$0xff]  }
  0xbd   :  { %3093 = vmatprep.subr.bf16.mxu0 %v4773_v11  ;;  %v4815_v11 = vld [vmem:[%s6888_s1 + $0x964] ss:$8 sps:$4 sm:$0xff]   ;;  %v4876_v2 = vld [vmem:[%s6888_s1 + $0x410] ss:$8 sps:$4 sm:$0xff]  }
  0xbe   :  { %v4879_v3 = vld [vmem:[%s6888_s1 + $0xa10] ss:$8 sps:$4 sm:$0xff]  }
  0xbf   :  { %2716 = vmatpush1.bf16.msra.mxu1 %v4768_v12  ;;  %v4810_v12 = vld [vmem:[%s6888_s1 + $0x360] ss:$8 sps:$4 sm:$0xff]  }
  0xc0   :  { %3094 = vmatpush1.bf16.msra.mxu0 %v4771_v13  ;;  %2748 = vmatprep.subr.bf16.mxu1 %v4776_v14  ;;  %v4813_v13 = vld [vmem:[%s6888_s1 + $0x960] ss:$8 sps:$4 sm:$0xff]   ;;  %v4818_v14 = vld [vmem:[%s6888_s1 + $0x374] ss:$8 sps:$4 sm:$0xff]  }
  0xc1   :  { %3126 = vmatprep.subr.bf16.mxu0 %v4779_v19  ;;  %v4827_v19 = vld [vmem:[%s6888_s1 + $0x984] ss:$8 sps:$4 sm:$0xff]  }
  0xc2   :  { %2718 = vmatmul.mubr.bf16.vlgmr.msra.gmra.mrb[0].mxu1 %v175_v23  ;;  %v4833_v23 = vld [vmem:[%s6888_s1 + $0x994] ss:$8 sps:$4 sm:$0xff]  }
  0xc3   :  { %3096 = vmatmul.mubr.bf16.vlgmr.msra.gmra.mrb[0].mxu0 %v187_v24  ;;  %2749 = vmatpush1.bf16.msra.mxu1 %v4774_v20  ;;  %v4822_v20 = vld [vmem:[%s6888_s1 + $0x380] ss:$8 sps:$4 sm:$0xff]   ;;  %v4828_v24 = vld [vmem:[%s6888_s1 + $0x390] ss:$8 sps:$4 sm:$0xff]  }
  0xc4   :  { %3127 = vmatpush1.bf16.msra.mxu0 %v4777_v21  ;;  %2750 = vmatprep.subr.bf16.mxu1 %v4782_v28  ;;  %v4825_v21 = vld [vmem:[%s6888_s1 + $0x980] ss:$8 sps:$4 sm:$0xff]  }
  0xc5   :  { %3128 = vmatprep.subr.bf16.mxu0 %v4785_v29  ;;  %2727 = vmatprep.mubr.bf16.mxu1 %v200_v32  ;;  %v4834_v28 = vld [vmem:[%s6888_s1 + $0x3a0] ss:$8 sps:$4 sm:$0xff]   ;;  %v4840_v32 = vld [vmem:[%s6888_s1 + $0x3b0] ss:$8 sps:$4 sm:$0xff]  }
  0xc6   :  { %3105 = vmatprep.mubr.bf16.mxu0 %v212_v33  ;;  %v4837_v29 = vld [vmem:[%s6888_s1 + $0x9a0] ss:$8 sps:$4 sm:$0xff]   ;;  %v4843_v33 = vld [vmem:[%s6888_s1 + $0x9b0] ss:$8 sps:$4 sm:$0xff]  }
  0xc7   :  { %2751 = vmatpush1.bf16.msra.mxu1 %v4780_v30  ;;  %v4842_v30 = vld [vmem:[%s6888_s1 + $0x3b4] ss:$8 sps:$4 sm:$0xff]  }
  0xc8   :  { %3129 = vmatpush1.bf16.msra.mxu0 %v4783_v31  ;;  %2752 = vmatprep.subr.bf16.mxu1 %v4788_v34  ;;  %v4845_v31 = vld [vmem:[%s6888_s1 + $0x9b4] ss:$8 sps:$4 sm:$0xff]   ;;  %v4848_v34 = vld [vmem:[%s6888_s1 + $0x3c4] ss:$8 sps:$4 sm:$0xff]  }
  0xc9   :  { %3130 = vmatprep.subr.bf16.mxu0 %v4791_v39  ;;  %v4857_v39 = vld [vmem:[%s6888_s1 + $0x9d4] ss:$8 sps:$4 sm:$0xff]  }
  0xca   :  { %2728 = vmatmul.mubr.bf16.gmra.mrb[4].mxu1 %v199_v43  ;;  %v4863_v43 = vld [vmem:[%s6888_s1 + $0x9e4] ss:$8 sps:$4 sm:$0xff]  }
  0xcb   :  { %3106 = vmatmul.mubr.bf16.gmra.mrb[4].mxu0 %v211_v44  ;;  %2753 = vmatpush1.bf16.msra.mxu1 %v4786_v40  ;;  %v4852_v40 = vld [vmem:[%s6888_s1 + $0x3d0] ss:$8 sps:$4 sm:$0xff]   ;;  %v4858_v44 = vld [vmem:[%s6888_s1 + $0x3e0] ss:$8 sps:$4 sm:$0xff]  }
  0xcc   :  { %3131 = vmatpush1.bf16.msra.mxu0 %v4789_v41  ;;  %2754 = vmatprep.subr.bf16.mxu1 %v4794_v48  ;;  %v4855_v41 = vld [vmem:[%s6888_s1 + $0x9d0] ss:$8 sps:$4 sm:$0xff]  }
  0xcd   :  { %3132 = vmatprep.subr.bf16.mxu0 %v4797_v49  ;;  %2737 = vmatprep.mubr.bf16.mxu1 %v224_v52  ;;  %v4864_v48 = vld [vmem:[%s6888_s1 + $0x3f0] ss:$8 sps:$4 sm:$0xff]  }
  0xce   :  { %3115 = vmatprep.mubr.bf16.mxu0 %v236_v53  ;;  %v4867_v49 = vld [vmem:[%s6888_s1 + $0x9f0] ss:$8 sps:$4 sm:$0xff]  }
  0xcf   :  { %2755 = vmatpush1.bf16.msra.mxu1 %v4792_v50  ;;  %v33_v50 = vld [vmem:[%s6887_s0 + $0x30] sm:$0xff] }
  0xd0   :  { %3133 = vmatpush1.bf16.msra.mxu0 %v4795_v51  ;;  %2756 = vmatprep.subr.bf16.mxu1 %v4800_v55  ;;  %v4872_v51 = vld [vmem:[%s6888_s1 + $0x404] ss:$8 sps:$4 sm:$0xff]   ;;  %v57_v52 = vld [vmem:[%s6887_s0 + $0xf0] sm:$0xff] }
  0xd1   :  { %3134 = vmatprep.subr.bf16.mxu0 %v4803_v59  ;;  %v45_v53 = vld [vmem:[%s6887_s0 + $0x90] sm:$0xff]  ;;  %v4875_v55 = vld [vmem:[%s6888_s1 + $0xa04] ss:$8 sps:$4 sm:$0xff]   ;;  %v106_v59 = vld [vmem:[%s6887_s0 + $0x278] sm:$0xff] }
  0xd2   :  { %2738 = vmatmul.mubr.bf16.gmra.mrb[8].mxu1 %v223_v0  ;;  %v4878_v0 = vld [vmem:[%s6888_s1 + $0x414] ss:$8 sps:$4 sm:$0xff]  }
  0xd3   :  { %3116 = vmatmul.mubr.bf16.gmra.mrb[8].mxu0 %v235_v1  ;;  %2757 = vmatpush1.bf16.msra.mxu1 %v4798_v60  ;;  %v177_v60 = vpack.c.bf16 %v57_v52, %v33_v50  ;;  %v4881_v1 = vld [vmem:[%s6888_s1 + $0xa14] ss:$8 sps:$4 sm:$0xff]   ;;  %v4912_v52 = vld [vmem:[%s6888_s1 + $0x470] ss:$8 sps:$4 sm:$0xff]  }
  0xd4   :  { %3135 = vmatpush1.bf16.msra.mxu0 %v4801_v61  ;;  %2758 = vmatprep.subr.bf16.mxu1 %v4806_v4  ;;  %v189_v61 = vpack.c.bf16 %v69_v54, %v45_v53  ;;  %v202_v4 = vpack.c.bf16 %v106_v59, %v82_v58  ;;  %v4914_v50 = vld [vmem:[%s6888_s1 + $0x474] ss:$8 sps:$4 sm:$0xff]   ;;  %v4915_v53 = vld [vmem:[%s6888_s1 + $0xa70] ss:$8 sps:$4 sm:$0xff]   ;;  %v4920_v54 = vld [vmem:[%s6888_s1 + $0x484] ss:$8 sps:$4 sm:$0xff]  }
  0xd5   :  { %3136 = vmatprep.subr.bf16.mxu0 %v4809_v5  ;;  %2780 = vmatprep.mubr.bf16.mxu1 %v178_v6  ;;  %v214_v5 = vpack.c.bf16 %v118_v63, %v94_v62  ;;  %v81_v6 = vld [vmem:[%s6887_s0 + $0x1b0] sm:$0xff]  ;;  %v4932_v62 = vld [vmem:[%s6888_s1 + $0x4a4] ss:$8 sps:$4 sm:$0xff]  }
  0xd6   :  { %3158 = vmatprep.mubr.bf16.mxu0 %v190_v7  ;;  %v4884_v7 = vld [vmem:[%s6888_s1 + $0x424] ss:$8 sps:$4 sm:$0xff]   ;;  %v4926_v58 = vld [vmem:[%s6888_s1 + $0x494] ss:$8 sps:$4 sm:$0xff]  }
  0xd7   :  { %2759 = vmatpush1.bf16.msra.mxu1 %v4804_v8  ;;  %v105_v8 = vld [vmem:[%s6887_s0 + $0x270] sm:$0xff]  ;;  %v4935_v63 = vld [vmem:[%s6888_s1 + $0xaa4] ss:$8 sps:$4 sm:$0xff]  }
  0xd8   :  { %3137 = vmatpush1.bf16.msra.mxu0 %v4807_v9  ;;  %2760 = vmatprep.subr.bf16.mxu1 %v4812_v10  ;;  %v93_v9 = vld [vmem:[%s6887_s0 + $0x210] sm:$0xff] }
  0xd9   :  { %3138 = vmatprep.subr.bf16.mxu0 %v4815_v11  ;;  %v117_v10 = vld [vmem:[%s6887_s0 + $0x2d0] sm:$0xff]  ;;  %v4887_v11 = vld [vmem:[%s6888_s1 + $0xa24] ss:$8 sps:$4 sm:$0xff]  }
  0xda   :  { %v4929_v59 = vld [vmem:[%s6888_s1 + $0xa94] ss:$8 sps:$4 sm:$0xff]  }
  0xdb   :  { %2761 = vmatpush1.bf16.msra.mxu1 %v4810_v12  ;;  %v4882_v12 = vld [vmem:[%s6888_s1 + $0x420] ss:$8 sps:$4 sm:$0xff]  }
  0xdc   :  { %3139 = vmatpush1.bf16.msra.mxu0 %v4813_v13  ;;  %2762 = vmatprep.subr.bf16.mxu1 %v4818_v14  ;;  %v4885_v13 = vld [vmem:[%s6888_s1 + $0xa20] ss:$8 sps:$4 sm:$0xff]   ;;  %v130_v14 = vld [vmem:[%s6887_s0 + $0x338] sm:$0xff] }
  0xdd   :  { %3140 = vmatprep.subr.bf16.mxu0 %v4821_v15  ;;  %v154_v15 = vld [vmem:[%s6887_s0 + $0x3f8] sm:$0xff] }
  0xdf   :  { %2763 = vmatpush1.bf16.msra.mxu1 %v4816_v16  ;;  %v201_v16 = vpack.c.bf16 %v105_v8, %v81_v6  ;;  %v4944_v6 = vld [vmem:[%s6888_s1 + $0x4c4] ss:$8 sps:$4 sm:$0xff]   ;;  %v4942_v8 = vld [vmem:[%s6888_s1 + $0x4c0] ss:$8 sps:$4 sm:$0xff]  }
  0xe0   :  { %3141 = vmatpush1.bf16.msra.mxu0 %v4819_v17  ;;  %2764 = vmatprep.subr.bf16.mxu1 %v4824_v18  ;;  %v213_v17 = vpack.c.bf16 %v117_v10, %v93_v9  ;;  %v142_v18 = vld [vmem:[%s6887_s0 + $0x398] sm:$0xff]  ;;  %v4945_v9 = vld [vmem:[%s6888_s1 + $0xac0] ss:$8 sps:$4 sm:$0xff]  }
  0xe1   :  { %3142 = vmatprep.subr.bf16.mxu0 %v4827_v19  ;;  %v166_v19 = vld [vmem:[%s6887_s0 + $0x458] sm:$0xff] }
  0xe2   :  { %v4950_v10 = vld [vmem:[%s6888_s1 + $0x4d4] ss:$8 sps:$4 sm:$0xff]  }
  0xe3   :  { %2765 = vmatpush1.bf16.msra.mxu1 %v4822_v20  ;;  %v4890_v20 = vld [vmem:[%s6888_s1 + $0x434] ss:$8 sps:$4 sm:$0xff]  }
  0xe4   :  { %3143 = vmatpush1.bf16.msra.mxu0 %v4825_v21  ;;  %2766 = vmatprep.subr.bf16.mxu1 %v4830_v22  ;;  %v4893_v21 = vld [vmem:[%s6888_s1 + $0xa34] ss:$8 sps:$4 sm:$0xff]   ;;  %v4888_v22 = vld [vmem:[%s6888_s1 + $0x430] ss:$8 sps:$4 sm:$0xff]  }
  0xe5   :  { %3144 = vmatprep.subr.bf16.mxu0 %v4833_v23  ;;  %v4891_v23 = vld [vmem:[%s6888_s1 + $0xa30] ss:$8 sps:$4 sm:$0xff]  }
  0xe7   :  { %2767 = vmatpush1.bf16.msra.mxu1 %v4828_v24  ;;  %v226_v24 = vpack.c.bf16 %v154_v15, %v130_v14  ;;  %v4956_v14 = vld [vmem:[%s6888_s1 + $0x4e4] ss:$8 sps:$4 sm:$0xff]  }
  0xe8   :  { %3145 = vmatpush1.bf16.msra.mxu0 %v4831_v25  ;;  %2768 = vmatprep.subr.bf16.mxu1 %v4836_v26  ;;  %v238_v25 = vpack.c.bf16 %v166_v19, %v142_v18  ;;  %v129_v26 = vld [vmem:[%s6887_s0 + $0x330] sm:$0xff]  ;;  %v4959_v15 = vld [vmem:[%s6888_s1 + $0xae4] ss:$8 sps:$4 sm:$0xff]  }
  0xe9   :  { %3146 = vmatprep.subr.bf16.mxu0 %v4839_v27  ;;  %v4896_v27 = vld [vmem:[%s6888_s1 + $0x444] ss:$8 sps:$4 sm:$0xff]   ;;  %v4962_v18 = vld [vmem:[%s6888_s1 + $0x4f4] ss:$8 sps:$4 sm:$0xff]  }
  0xea   :  { %v4965_v19 = vld [vmem:[%s6888_s1 + $0xaf4] ss:$8 sps:$4 sm:$0xff]  }
  0xeb   :  { %2769 = vmatpush1.bf16.msra.mxu1 %v4834_v28  ;;  %v153_v28 = vld [vmem:[%s6887_s0 + $0x3f0] sm:$0xff] }
  0xec   :  { %3147 = vmatpush1.bf16.msra.mxu0 %v4837_v29  ;;  %2770 = vmatprep.subr.bf16.mxu1 %v4842_v30  ;;  %v141_v29 = vld [vmem:[%s6887_s0 + $0x390] sm:$0xff] }
  0xed   :  { %3148 = vmatprep.subr.bf16.mxu0 %v4845_v31  ;;  %v165_v30 = vld [vmem:[%s6887_s0 + $0x450] sm:$0xff]  ;;  %v4899_v31 = vld [vmem:[%s6888_s1 + $0xa44] ss:$8 sps:$4 sm:$0xff]  }
  0xef   :  { %2771 = vmatpush1.bf16.msra.mxu1 %v4840_v32  ;;  %v4894_v32 = vld [vmem:[%s6888_s1 + $0x440] ss:$8 sps:$4 sm:$0xff]  }
  0xf0   :  { %3149 = vmatpush1.bf16.msra.mxu0 %v4843_v33  ;;  %2772 = vmatprep.subr.bf16.mxu1 %v4848_v34  ;;  %v4897_v33 = vld [vmem:[%s6888_s1 + $0xa40] ss:$8 sps:$4 sm:$0xff]  }
  0xf1   :  { %3150 = vmatprep.subr.bf16.mxu0 %v4851_v35  ;;  %v36_v34 = vld [vmem:[%s6887_s0 + $0x48] sm:$0xff] }
  0xf2   :  { %v60_v35 = vld [vmem:[%s6887_s0 + $0x108] sm:$0xff] }
  0xf3   :  { %2773 = vmatpush1.bf16.msra.mxu1 %v4846_v36  ;;  %v225_v36 = vpack.c.bf16 %v153_v28, %v129_v26  ;;  %v4968_v26 = vld [vmem:[%s6888_s1 + $0x504] ss:$8 sps:$4 sm:$0xff]  }
  0xf4   :  { %3151 = vmatpush1.bf16.msra.mxu0 %v4849_v37  ;;  %2774 = vmatprep.subr.bf16.mxu1 %v4854_v38  ;;  %v237_v37 = vpack.c.bf16 %v165_v30, %v141_v29  ;;  %v48_v38 = vld [vmem:[%s6887_s0 + $0xa8] sm:$0xff] }
  0xf5   :  { %3152 = vmatprep.subr.bf16.mxu0 %v4857_v39  ;;  %v72_v39 = vld [vmem:[%s6887_s0 + $0x168] sm:$0xff] }
  0xf6   :  { %v84_v28 = vld [vmem:[%s6887_s0 + $0x1c8] sm:$0xff] }
  0xf7   :  { %2775 = vmatpush1.bf16.msra.mxu1 %v4852_v40  ;;  %v4902_v40 = vld [vmem:[%s6888_s1 + $0x454] ss:$8 sps:$4 sm:$0xff]  }
  0xf8   :  { %3153 = vmatpush1.bf16.msra.mxu0 %v4855_v41  ;;  %2776 = vmatprep.subr.bf16.mxu1 %v4860_v42  ;;  %v4905_v41 = vld [vmem:[%s6888_s1 + $0xa54] ss:$8 sps:$4 sm:$0xff]   ;;  %v180_v42 = vpack.c.bf16 %v60_v35, %v36_v34  ;;  %v4966_v34 = vld [vmem:[%s6888_s1 + $0x500] ss:$8 sps:$4 sm:$0xff]  }
  0xf9   :  { %3154 = vmatprep.subr.bf16.mxu0 %v4863_v43  ;;  %v192_v43 = vpack.c.bf16 %v72_v39, %v48_v38  ;;  %v4969_v35 = vld [vmem:[%s6888_s1 + $0xb00] ss:$8 sps:$4 sm:$0xff]  }
  0xfb   :  { %2777 = vmatpush1.bf16.msra.mxu1 %v4858_v44  ;;  %v4900_v44 = vld [vmem:[%s6888_s1 + $0x450] ss:$8 sps:$4 sm:$0xff]  }
  0xfc   :  { %3155 = vmatpush1.bf16.msra.mxu0 %v4861_v45  ;;  %2778 = vmatprep.subr.bf16.mxu1 %v4866_v46  ;;  %v4903_v45 = vld [vmem:[%s6888_s1 + $0xa50] ss:$8 sps:$4 sm:$0xff]   ;;  %v4908_v46 = vld [vmem:[%s6888_s1 + $0x464] ss:$8 sps:$4 sm:$0xff]  }
  0xfd   :  { %3156 = vmatprep.subr.bf16.mxu0 %v4869_v47  ;;  %v4911_v47 = vld [vmem:[%s6888_s1 + $0xa64] ss:$8 sps:$4 sm:$0xff]  }
  0xff   :  { %2779 = vmatpush1.bf16.msra.mxu1 %v4864_v48  ;;  %v4906_v48 = vld [vmem:[%s6888_s1 + $0x460] ss:$8 sps:$4 sm:$0xff]  }
 0x100   :  { %3157 = vmatpush1.bf16.msra.mxu0 %v4867_v49  ;;  %2811 = vmatprep.subr.bf16.mxu1 %v4872_v51  ;;  %v4909_v49 = vld [vmem:[%s6888_s1 + $0xa60] ss:$8 sps:$4 sm:$0xff]   ;;  %v4917_v51 = vld [vmem:[%s6888_s1 + $0xa74] ss:$8 sps:$4 sm:$0xff]  }
 0x101   :  { %3189 = vmatprep.subr.bf16.mxu0 %v4875_v55  ;;  %v4923_v55 = vld [vmem:[%s6888_s1 + $0xa84] ss:$8 sps:$4 sm:$0xff]  }
 0x102   :  { %2781 = vmatmul.mubr.bf16.vlgmr.msra.gmra.mrb[0].mxu1 %v177_v60  ;;  %v4924_v60 = vld [vmem:[%s6888_s1 + $0x490] ss:$8 sps:$4 sm:$0xff]  }
 0x103   :  { %3159 = vmatmul.mubr.bf16.vlgmr.msra.gmra.mrb[0].mxu0 %v189_v61  ;;  %2812 = vmatpush1.bf16.msra.mxu1 %v4870_v56  ;;  %v4918_v56 = vld [vmem:[%s6888_s1 + $0x480] ss:$8 sps:$4 sm:$0xff]   ;;  %v4927_v61 = vld [vmem:[%s6888_s1 + $0xa90] ss:$8 sps:$4 sm:$0xff]  }
 0x104   :  { %3190 = vmatpush1.bf16.msra.mxu0 %v4873_v57  ;;  %2813 = vmatprep.subr.bf16.mxu1 %v4878_v0  ;;  %v4921_v57 = vld [vmem:[%s6888_s1 + $0xa80] ss:$8 sps:$4 sm:$0xff]  }
 0x105   :  { %3191 = vmatprep.subr.bf16.mxu0 %v4881_v1  ;;  %2790 = vmatprep.mubr.bf16.mxu1 %v202_v4  ;;  %v4930_v0 = vld [vmem:[%s6888_s1 + $0x4a0] ss:$8 sps:$4 sm:$0xff]   ;;  %v4936_v4 = vld [vmem:[%s6888_s1 + $0x4b0] ss:$8 sps:$4 sm:$0xff]  }
 0x106   :  { %3168 = vmatprep.mubr.bf16.mxu0 %v214_v5  ;;  %v4933_v1 = vld [vmem:[%s6888_s1 + $0xaa0] ss:$8 sps:$4 sm:$0xff]   ;;  %v4939_v5 = vld [vmem:[%s6888_s1 + $0xab0] ss:$8 sps:$4 sm:$0xff]  }
 0x107   :  { %2814 = vmatpush1.bf16.msra.mxu1 %v4876_v2  ;;  %v4938_v2 = vld [vmem:[%s6888_s1 + $0x4b4] ss:$8 sps:$4 sm:$0xff]  }
 0x108   :  { %3192 = vmatpush1.bf16.msra.mxu0 %v4879_v3  ;;  %2815 = vmatprep.subr.bf16.mxu1 %v4884_v7  ;;  %v4941_v3 = vld [vmem:[%s6888_s1 + $0xab4] ss:$8 sps:$4 sm:$0xff]   ;;  %v4947_v7 = vld [vmem:[%s6888_s1 + $0xac4] ss:$8 sps:$4 sm:$0xff]  }
 0x109   :  { %3193 = vmatprep.subr.bf16.mxu0 %v4887_v11  ;;  %v4953_v11 = vld [vmem:[%s6888_s1 + $0xad4] ss:$8 sps:$4 sm:$0xff]  }
 0x10a   :  { %2791 = vmatmul.mubr.bf16.gmra.mrb[4].mxu1 %v201_v16  ;;  %v4954_v16 = vld [vmem:[%s6888_s1 + $0x4e0] ss:$8 sps:$4 sm:$0xff]  }
 0x10b   :  { %3169 = vmatmul.mubr.bf16.gmra.mrb[4].mxu0 %v213_v17  ;;  %2816 = vmatpush1.bf16.msra.mxu1 %v4882_v12  ;;  %v4948_v12 = vld [vmem:[%s6888_s1 + $0x4d0] ss:$8 sps:$4 sm:$0xff]   ;;  %v4957_v17 = vld [vmem:[%s6888_s1 + $0xae0] ss:$8 sps:$4 sm:$0xff]  }
 0x10c   :  { %3194 = vmatpush1.bf16.msra.mxu0 %v4885_v13  ;;  %2817 = vmatprep.subr.bf16.mxu1 %v4890_v20  ;;  %v4951_v13 = vld [vmem:[%s6888_s1 + $0xad0] ss:$8 sps:$4 sm:$0xff]  }
 0x10d   :  { %3195 = vmatprep.subr.bf16.mxu0 %v4893_v21  ;;  %2800 = vmatprep.mubr.bf16.mxu1 %v226_v24  ;;  %v4960_v20 = vld [vmem:[%s6888_s1 + $0x4f0] ss:$8 sps:$4 sm:$0xff]   ;;  %v47_v24 = vld [vmem:[%s6887_s0 + $0xa0] sm:$0xff] }
 0x10e   :  { %3178 = vmatprep.mubr.bf16.mxu0 %v238_v25  ;;  %v4963_v21 = vld [vmem:[%s6888_s1 + $0xaf0] ss:$8 sps:$4 sm:$0xff]   ;;  %v71_v25 = vld [vmem:[%s6887_s0 + $0x160] sm:$0xff] }
 0x10f   :  { %2818 = vmatpush1.bf16.msra.mxu1 %v4888_v22  ;;  %v35_v22 = vld [vmem:[%s6887_s0 + $0x40] sm:$0xff]  ;;  %v191_v30 = vpack.c.bf16 %v71_v25, %v47_v24  ;;  %v5008_v24 = vld [vmem:[%s6888_s1 + $0x570] ss:$8 sps:$4 sm:$0xff]  }
 0x110   :  { %3196 = vmatpush1.bf16.msra.mxu0 %v4891_v23  ;;  %2819 = vmatprep.subr.bf16.mxu1 %v4896_v27  ;;  %v59_v23 = vld [vmem:[%s6887_s0 + $0x100] sm:$0xff]  ;;  %v5011_v25 = vld [vmem:[%s6888_s1 + $0xb70] ss:$8 sps:$4 sm:$0xff]  }
 0x111   :  { %3197 = vmatprep.subr.bf16.mxu0 %v4899_v31  ;;  %v4971_v27 = vld [vmem:[%s6888_s1 + $0xb04] ss:$8 sps:$4 sm:$0xff]   ;;  %v179_v29 = vpack.c.bf16 %v59_v23, %v35_v22  ;;  %v5010_v22 = vld [vmem:[%s6888_s1 + $0x574] ss:$8 sps:$4 sm:$0xff]  }
 0x112   :  { %2801 = vmatmul.mubr.bf16.gmra.mrb[8].mxu1 %v225_v36  ;;  %v108_v31 = vld [vmem:[%s6887_s0 + $0x288] sm:$0xff]  ;;  %v4974_v36 = vld [vmem:[%s6888_s1 + $0x514] ss:$8 sps:$4 sm:$0xff]  }
 0x113   :  { %3179 = vmatmul.mubr.bf16.gmra.mrb[8].mxu0 %v237_v37  ;;  %2820 = vmatpush1.bf16.msra.mxu1 %v4894_v32  ;;  %v96_v32 = vld [vmem:[%s6887_s0 + $0x228] sm:$0xff]  ;;  %v4977_v37 = vld [vmem:[%s6888_s1 + $0xb14] ss:$8 sps:$4 sm:$0xff]   ;;  %v204_v38 = vpack.c.bf16 %v108_v31, %v84_v28 }
 0x114   :  { %3198 = vmatpush1.bf16.msra.mxu0 %v4897_v33  ;;  %2821 = vmatprep.subr.bf16.mxu1 %v4902_v40  ;;  %v120_v33 = vld [vmem:[%s6887_s0 + $0x2e8] sm:$0xff]  ;;  %v4972_v40 = vld [vmem:[%s6888_s1 + $0x510] ss:$8 sps:$4 sm:$0xff]   ;;  %v5013_v23 = vld [vmem:[%s6888_s1 + $0xb74] ss:$8 sps:$4 sm:$0xff]  }
 0x115   :  { %3199 = vmatprep.subr.bf16.mxu0 %v4905_v41  ;;  %2843 = vmatprep.mubr.bf16.mxu1 %v180_v42  ;;  %v216_v39 = vpack.c.bf16 %v120_v33, %v96_v32  ;;  %v4975_v41 = vld [vmem:[%s6888_s1 + $0xb10] ss:$8 sps:$4 sm:$0xff]   ;;  %v83_v42 = vld [vmem:[%s6887_s0 + $0x1c0] sm:$0xff]  ;;  %v5025_v31 = vld [vmem:[%s6888_s1 + $0xb94] ss:$8 sps:$4 sm:$0xff]  }
 0x116   :  { %3221 = vmatprep.mubr.bf16.mxu0 %v192_v43  ;;  %v107_v43 = vld [vmem:[%s6887_s0 + $0x280] sm:$0xff]  ;;  %v5020_v32 = vld [vmem:[%s6888_s1 + $0x590] ss:$8 sps:$4 sm:$0xff]  }
 0x117   :  { %2822 = vmatpush1.bf16.msra.mxu1 %v4900_v44  ;;  %v95_v44 = vld [vmem:[%s6887_s0 + $0x220] sm:$0xff]  ;;  %v5023_v33 = vld [vmem:[%s6888_s1 + $0xb90] ss:$8 sps:$4 sm:$0xff]  }
 0x118   :  { %3200 = vmatpush1.bf16.msra.mxu0 %v4903_v45  ;;  %2823 = vmatprep.subr.bf16.mxu1 %v4908_v46  ;;  %v119_v45 = vld [vmem:[%s6887_s0 + $0x2e0] sm:$0xff] }
 0x119   :  { %3201 = vmatprep.subr.bf16.mxu0 %v4911_v47  ;;  %v4980_v46 = vld [vmem:[%s6888_s1 + $0x524] ss:$8 sps:$4 sm:$0xff]   ;;  %v5014_v28 = vld [vmem:[%s6888_s1 + $0x580] ss:$8 sps:$4 sm:$0xff]  }
 0x11a   :  { %v4983_v47 = vld [vmem:[%s6888_s1 + $0xb24] ss:$8 sps:$4 sm:$0xff]  }
 0x11b   :  { %2824 = vmatpush1.bf16.msra.mxu1 %v4906_v48  ;;  %v132_v48 = vld [vmem:[%s6887_s0 + $0x348] sm:$0xff] }
 0x11c   :  { %3202 = vmatpush1.bf16.msra.mxu0 %v4909_v49  ;;  %2825 = vmatprep.subr.bf16.mxu1 %v4914_v50  ;;  %v203_v49 = vpack.c.bf16 %v107_v43, %v83_v42  ;;  %v215_v50 = vpack.c.bf16 %v119_v45, %v95_v44  ;;  %v5040_v42 = vld [vmem:[%s6888_s1 + $0x5c4] ss:$8 sps:$4 sm:$0xff]   ;;  %v5038_v44 = vld [vmem:[%s6888_s1 + $0x5c0] ss:$8 sps:$4 sm:$0xff]  }
 0x11d   :  { %3203 = vmatprep.subr.bf16.mxu0 %v4917_v51  ;;  %v156_v51 = vld [vmem:[%s6887_s0 + $0x408] sm:$0xff] }
 0x11e   :  { %v5043_v43 = vld [vmem:[%s6888_s1 + $0xbc4] ss:$8 sps:$4 sm:$0xff]   ;;  %v5041_v45 = vld [vmem:[%s6888_s1 + $0xbc0] ss:$8 sps:$4 sm:$0xff]  }
 0x11f   :  { %2826 = vmatpush1.bf16.msra.mxu1 %v4912_v52  ;;  %v144_v52 = vld [vmem:[%s6887_s0 + $0x3a8] sm:$0xff] }
 0x120   :  { %3204 = vmatpush1.bf16.msra.mxu0 %v4915_v53  ;;  %2827 = vmatprep.subr.bf16.mxu1 %v4920_v54  ;;  %v168_v53 = vld [vmem:[%s6887_s0 + $0x468] sm:$0xff] }
 0x121   :  { %3205 = vmatprep.subr.bf16.mxu0 %v4923_v55  ;;  %v4978_v54 = vld [vmem:[%s6888_s1 + $0x520] ss:$8 sps:$4 sm:$0xff]  }
 0x122   :  { %v4981_v55 = vld [vmem:[%s6888_s1 + $0xb20] ss:$8 sps:$4 sm:$0xff]  }
 0x123   :  { %2828 = vmatpush1.bf16.msra.mxu1 %v4918_v56  ;;  %v4986_v56 = vld [vmem:[%s6888_s1 + $0x534] ss:$8 sps:$4 sm:$0xff]  }
 0x124   :  { %3206 = vmatpush1.bf16.msra.mxu0 %v4921_v57  ;;  %2829 = vmatprep.subr.bf16.mxu1 %v4926_v58  ;;  %v4989_v57 = vld [vmem:[%s6888_s1 + $0xb34] ss:$8 sps:$4 sm:$0xff]   ;;  %v228_v58 = vpack.c.bf16 %v156_v51, %v132_v48  ;;  %v5044_v48 = vld [vmem:[%s6888_s1 + $0x5d0] ss:$8 sps:$4 sm:$0xff]   ;;  %v5055_v51 = vld [vmem:[%s6888_s1 + $0xbe4] ss:$8 sps:$4 sm:$0xff]  }
 0x125   :  { %3207 = vmatprep.subr.bf16.mxu0 %v4929_v59  ;;  %v240_v59 = vpack.c.bf16 %v168_v53, %v144_v52  ;;  %v5050_v52 = vld [vmem:[%s6888_s1 + $0x5e0] ss:$8 sps:$4 sm:$0xff]  }
 0x126   :  { %v5053_v53 = vld [vmem:[%s6888_s1 + $0xbe0] ss:$8 sps:$4 sm:$0xff]  }
 0x127   :  { %2830 = vmatpush1.bf16.msra.mxu1 %v4924_v60  ;;  %v4984_v60 = vld [vmem:[%s6888_s1 + $0x530] ss:$8 sps:$4 sm:$0xff]  }
 0x128   :  { %3208 = vmatpush1.bf16.msra.mxu0 %v4927_v61  ;;  %2831 = vmatprep.subr.bf16.mxu1 %v4932_v62  ;;  %v4987_v61 = vld [vmem:[%s6888_s1 + $0xb30] ss:$8 sps:$4 sm:$0xff]   ;;  %v131_v62 = vld [vmem:[%s6887_s0 + $0x340] sm:$0xff] }
 0x129   :  { %3209 = vmatprep.subr.bf16.mxu0 %v4935_v63  ;;  %v155_v63 = vld [vmem:[%s6887_s0 + $0x400] sm:$0xff] }
 0x12b   :  { %2832 = vmatpush1.bf16.msra.mxu1 %v4930_v0  ;;  %v143_v0 = vld [vmem:[%s6887_s0 + $0x3a0] sm:$0xff] }
 0x12c   :  { %3210 = vmatpush1.bf16.msra.mxu0 %v4933_v1  ;;  %2833 = vmatprep.subr.bf16.mxu1 %v4938_v2  ;;  %v167_v1 = vld [vmem:[%s6887_s0 + $0x460] sm:$0xff] }
 0x12d   :  { %3211 = vmatprep.subr.bf16.mxu0 %v4941_v3  ;;  %v4992_v2 = vld [vmem:[%s6888_s1 + $0x544] ss:$8 sps:$4 sm:$0xff]  }
 0x12e   :  { %v4995_v3 = vld [vmem:[%s6888_s1 + $0xb44] ss:$8 sps:$4 sm:$0xff]  }
 0x12f   :  { %2834 = vmatpush1.bf16.msra.mxu1 %v4936_v4  ;;  %v38_v4 = vld [vmem:[%s6887_s0 + $0x58] sm:$0xff] }
 0x130   :  { %3212 = vmatpush1.bf16.msra.mxu0 %v4939_v5  ;;  %2835 = vmatprep.subr.bf16.mxu1 %v4944_v6  ;;  %v227_v5 = vpack.c.bf16 %v155_v63, %v131_v62  ;;  %v239_v6 = vpack.c.bf16 %v167_v1, %v143_v0  ;;  %v86_v62 = vld [vmem:[%s6887_s0 + $0x1d8] sm:$0xff] }
 0x131   :  { %3213 = vmatprep.subr.bf16.mxu0 %v4947_v7  ;;  %v62_v7 = vld [vmem:[%s6887_s0 + $0x118] sm:$0xff] }
 0x132   :  { %v110_v63 = vld [vmem:[%s6887_s0 + $0x298] sm:$0xff] }
 0x133   :  { %2836 = vmatpush1.bf16.msra.mxu1 %v4942_v8  ;;  %v50_v8 = vld [vmem:[%s6887_s0 + $0xb8] sm:$0xff] }
 0x134   :  { %3214 = vmatpush1.bf16.msra.mxu0 %v4945_v9  ;;  %2837 = vmatprep.subr.bf16.mxu1 %v4950_v10  ;;  %v74_v9 = vld [vmem:[%s6887_s0 + $0x178] sm:$0xff]  ;;  %v4990_v10 = vld [vmem:[%s6888_s1 + $0x540] ss:$8 sps:$4 sm:$0xff]  }
 0x135   :  { %3215 = vmatprep.subr.bf16.mxu0 %v4953_v11  ;;  %v4993_v11 = vld [vmem:[%s6888_s1 + $0xb40] ss:$8 sps:$4 sm:$0xff]   ;;  %v98_v0 = vld [vmem:[%s6887_s0 + $0x238] sm:$0xff] }
 0x136   :  { %v122_v1 = vld [vmem:[%s6887_s0 + $0x2f8] sm:$0xff] }
 0x137   :  { %2838 = vmatpush1.bf16.msra.mxu1 %v4948_v12  ;;  %v4998_v12 = vld [vmem:[%s6888_s1 + $0x554] ss:$8 sps:$4 sm:$0xff]  }
 0x138   :  { %3216 = vmatpush1.bf16.msra.mxu0 %v4951_v13  ;;  %2839 = vmatprep.subr.bf16.mxu1 %v4956_v14  ;;  %v5001_v13 = vld [vmem:[%s6888_s1 + $0xb54] ss:$8 sps:$4 sm:$0xff]   ;;  %v182_v14 = vpack.c.bf16 %v62_v7, %v38_v4  ;;  %v206_v4 = vpack.c.bf16 %v110_v63, %v86_v62 }
 0x139   :  { %3217 = vmatprep.subr.bf16.mxu0 %v4959_v15  ;;  %v194_v15 = vpack.c.bf16 %v74_v9, %v50_v8  ;;  %v109_v7 = vld [vmem:[%s6887_s0 + $0x290] sm:$0xff] }
 0x13a   :  { %v97_v8 = vld [vmem:[%s6887_s0 + $0x230] sm:$0xff] }
 0x13b   :  { %2840 = vmatpush1.bf16.msra.mxu1 %v4954_v16  ;;  %v4996_v16 = vld [vmem:[%s6888_s1 + $0x550] ss:$8 sps:$4 sm:$0xff]  }
 0x13c   :  { %3218 = vmatpush1.bf16.msra.mxu0 %v4957_v17  ;;  %2841 = vmatprep.subr.bf16.mxu1 %v4962_v18  ;;  %v4999_v17 = vld [vmem:[%s6888_s1 + $0xb50] ss:$8 sps:$4 sm:$0xff]   ;;  %v5004_v18 = vld [vmem:[%s6888_s1 + $0x564] ss:$8 sps:$4 sm:$0xff]  }
 0x13d   :  { %3219 = vmatprep.subr.bf16.mxu0 %v4965_v19  ;;  %v5007_v19 = vld [vmem:[%s6888_s1 + $0xb64] ss:$8 sps:$4 sm:$0xff]   ;;  %v121_v9 = vld [vmem:[%s6887_s0 + $0x2f0] sm:$0xff] }
 0x13f   :  { %2842 = vmatpush1.bf16.msra.mxu1 %v4960_v20  ;;  %v5002_v20 = vld [vmem:[%s6888_s1 + $0x560] ss:$8 sps:$4 sm:$0xff]  }
 0x140   :  { %3220 = vmatpush1.bf16.msra.mxu0 %v4963_v21  ;;  %2874 = vmatprep.subr.bf16.mxu1 %v4968_v26  ;;  %v5005_v21 = vld [vmem:[%s6888_s1 + $0xb60] ss:$8 sps:$4 sm:$0xff]   ;;  %v5016_v26 = vld [vmem:[%s6888_s1 + $0x584] ss:$8 sps:$4 sm:$0xff]  }
 0x141   :  { %3252 = vmatprep.subr.bf16.mxu0 %v4971_v27  ;;  %v5019_v27 = vld [vmem:[%s6888_s1 + $0xb84] ss:$8 sps:$4 sm:$0xff]  }
 0x142   :  { %2844 = vmatmul.mubr.bf16.vlgmr.msra.gmra.mrb[0].mxu1 %v179_v29  ;;  %v5017_v29 = vld [vmem:[%s6888_s1 + $0xb80] ss:$8 sps:$4 sm:$0xff]  }
 0x143   :  { %3222 = vmatmul.mubr.bf16.vlgmr.msra.gmra.mrb[0].mxu0 %v191_v30  ;;  %2875 = vmatpush1.bf16.msra.mxu1 %v4966_v34  ;;  %v5022_v30 = vld [vmem:[%s6888_s1 + $0x594] ss:$8 sps:$4 sm:$0xff]   ;;  %v5028_v34 = vld [vmem:[%s6888_s1 + $0x5a4] ss:$8 sps:$4 sm:$0xff]  }
 0x144   :  { %3253 = vmatpush1.bf16.msra.mxu0 %v4969_v35  ;;  %2876 = vmatprep.subr.bf16.mxu1 %v4974_v36  ;;  %v5031_v35 = vld [vmem:[%s6888_s1 + $0xba4] ss:$8 sps:$4 sm:$0xff]   ;;  %v5026_v36 = vld [vmem:[%s6888_s1 + $0x5a0] ss:$8 sps:$4 sm:$0xff]  }
 0x145   :  { %3254 = vmatprep.subr.bf16.mxu0 %v4977_v37  ;;  %2853 = vmatprep.mubr.bf16.mxu1 %v204_v38  ;;  %v5029_v37 = vld [vmem:[%s6888_s1 + $0xba0] ss:$8 sps:$4 sm:$0xff]   ;;  %v5034_v38 = vld [vmem:[%s6888_s1 + $0x5b4] ss:$8 sps:$4 sm:$0xff]  }
 0x146   :  { %3231 = vmatprep.mubr.bf16.mxu0 %v216_v39  ;;  %v5037_v39 = vld [vmem:[%s6888_s1 + $0xbb4] ss:$8 sps:$4 sm:$0xff]  }
 0x147   :  { %2877 = vmatpush1.bf16.msra.mxu1 %v4972_v40  ;;  %v5032_v40 = vld [vmem:[%s6888_s1 + $0x5b0] ss:$8 sps:$4 sm:$0xff]  }
 0x148   :  { %3255 = vmatpush1.bf16.msra.mxu0 %v4975_v41  ;;  %2878 = vmatprep.subr.bf16.mxu1 %v4980_v46  ;;  %v5035_v41 = vld [vmem:[%s6888_s1 + $0xbb0] ss:$8 sps:$4 sm:$0xff]   ;;  %v5046_v46 = vld [vmem:[%s6888_s1 + $0x5d4] ss:$8 sps:$4 sm:$0xff]  }
 0x149   :  { %3256 = vmatprep.subr.bf16.mxu0 %v4983_v47  ;;  %v5049_v47 = vld [vmem:[%s6888_s1 + $0xbd4] ss:$8 sps:$4 sm:$0xff]  }
 0x14a   :  { %2854 = vmatmul.mubr.bf16.gmra.mrb[4].mxu1 %v203_v49  ;;  %v5047_v49 = vld [vmem:[%s6888_s1 + $0xbd0] ss:$8 sps:$4 sm:$0xff]  }
 0x14b   :  { %3232 = vmatmul.mubr.bf16.gmra.mrb[4].mxu0 %v215_v50  ;;  %2879 = vmatpush1.bf16.msra.mxu1 %v4978_v54  ;;  %v5052_v50 = vld [vmem:[%s6888_s1 + $0x5e4] ss:$8 sps:$4 sm:$0xff]   ;;  %v5058_v54 = vld [vmem:[%s6888_s1 + $0x5f4] ss:$8 sps:$4 sm:$0xff]  }
 0x14c   :  { %3257 = vmatpush1.bf16.msra.mxu0 %v4981_v55  ;;  %2880 = vmatprep.subr.bf16.mxu1 %v4986_v56  ;;  %v5061_v55 = vld [vmem:[%s6888_s1 + $0xbf4] ss:$8 sps:$4 sm:$0xff]   ;;  %v5056_v56 = vld [vmem:[%s6888_s1 + $0x5f0] ss:$8 sps:$4 sm:$0xff]  }
 0x14d   :  { %3258 = vmatprep.subr.bf16.mxu0 %v4989_v57  ;;  %2863 = vmatprep.mubr.bf16.mxu1 %v228_v58  ;;  %v5059_v57 = vld [vmem:[%s6888_s1 + $0xbf0] ss:$8 sps:$4 sm:$0xff]  }
 0x14e   :  { %3241 = vmatprep.mubr.bf16.mxu0 %v240_v59  ;;  %v37_v58 = vld [vmem:[%s6887_s0 + $0x50] sm:$0xff] }
 0x14f   :  { %2881 = vmatpush1.bf16.msra.mxu1 %v4984_v60  ;;  %v61_v59 = vld [vmem:[%s6887_s0 + $0x110] sm:$0xff] }
 0x150   :  { %3259 = vmatpush1.bf16.msra.mxu0 %v4987_v61  ;;  %2882 = vmatprep.subr.bf16.mxu1 %v4992_v2  ;;  %v49_v60 = vld [vmem:[%s6887_s0 + $0xb0] sm:$0xff]  ;;  %v181_v2 = vpack.c.bf16 %v61_v59, %v37_v58 }
 0x151   :  { %3260 = vmatprep.subr.bf16.mxu0 %v4995_v3  ;;  %v73_v61 = vld [vmem:[%s6887_s0 + $0x170] sm:$0xff] }
 0x152   :  { %2864 = vmatmul.mubr.bf16.gmra.mrb[8].mxu1 %v227_v5  ;;  %v193_v3 = vpack.c.bf16 %v73_v61, %v49_v60  ;;  %v218_v5 = vpack.c.bf16 %v122_v1, %v98_v0 }
 0x153   :  { %3242 = vmatmul.mubr.bf16.gmra.mrb[8].mxu0 %v239_v6  ;;  %2883 = vmatpush1.bf16.msra.mxu1 %v4990_v10  ;;  %v85_v6 = vld [vmem:[%s6887_s0 + $0x1d0] sm:$0xff]  ;;  %v134_v10 = vld [vmem:[%s6887_s0 + $0x358] sm:$0xff] }
 0x154   :  { %3261 = vmatpush1.bf16.msra.mxu0 %v4993_v11  ;;  %2884 = vmatprep.subr.bf16.mxu1 %v4998_v12  ;;  %v158_v11 = vld [vmem:[%s6887_s0 + $0x418] sm:$0xff] }
 0x155   :  { %3262 = vmatprep.subr.bf16.mxu0 %v5001_v13  ;;  %2906 = vmatprep.mubr.bf16.mxu1 %v182_v14  ;;  %v146_v12 = vld [vmem:[%s6887_s0 + $0x3b8] sm:$0xff]  ;;  %v205_v14 = vpack.c.bf16 %v109_v7, %v85_v6 }
 0x156   :  { %3284 = vmatprep.mubr.bf16.mxu0 %v194_v15  ;;  %v170_v13 = vld [vmem:[%s6887_s0 + $0x478] sm:$0xff]  ;;  %v217_v15 = vpack.c.bf16 %v121_v9, %v97_v8 }
 0x157   :  { %2885 = vmatpush1.bf16.msra.mxu1 %v4996_v16  ;;  %v230_v16 = vpack.c.bf16 %v158_v11, %v134_v10 }
 0x158   :  { %3263 = vmatpush1.bf16.msra.mxu0 %v4999_v17  ;;  %2886 = vmatprep.subr.bf16.mxu1 %v5004_v18  ;;  %v242_v17 = vpack.c.bf16 %v170_v13, %v146_v12  ;;  %v133_v18 = vld [vmem:[%s6887_s0 + $0x350] sm:$0xff] }
 0x159   :  { %3264 = vmatprep.subr.bf16.mxu0 %v5007_v19  ;;  %v157_v19 = vld [vmem:[%s6887_s0 + $0x410] sm:$0xff] }
 0x15b   :  { %2887 = vmatpush1.bf16.msra.mxu1 %v5002_v20  ;;  %v145_v20 = vld [vmem:[%s6887_s0 + $0x3b0] sm:$0xff] }
 0x15c   :  { %3265 = vmatpush1.bf16.msra.mxu0 %v5005_v21  ;;  %2888 = vmatprep.subr.bf16.mxu1 %v5010_v22  ;;  %v169_v21 = vld [vmem:[%s6887_s0 + $0x470] sm:$0xff]  ;;  %v229_v22 = vpack.c.bf16 %v157_v19, %v133_v18 }
 0x15d   :  { %3266 = vmatprep.subr.bf16.mxu0 %v5013_v23  ;;  %v241_v23 = vpack.c.bf16 %v169_v21, %v145_v20 }
 0x15f   :  { %2889 = vmatpush1.bf16.msra.mxu1 %v5008_v24  ;;  %v5062_v24 = vld [vmem:[%s6890_s3 + $0x40] sm:$0xff]  }
 0x160   :  { %3267 = vmatpush1.bf16.msra.mxu0 %v5011_v25  ;;  %2890 = vmatprep.subr.bf16.mxu1 %v5016_v26  ;;  %v5063_v25 = vld [vmem:[%s6890_s3] sm:$0xff]   ;;  %v5064_v26 = vld [vmem:[%s6890_s3 + $0x48] sm:$0xff]  }
 0x161   :  { %3268 = vmatprep.subr.bf16.mxu0 %v5019_v27  ;;  %v5065_v27 = vld [vmem:[%s6890_s3 + $0x8] sm:$0xff]  }
 0x163   :  { %2891 = vmatpush1.bf16.msra.mxu1 %v5014_v28  ;;  %v5066_v28 = vld [vmem:[%s6890_s3 + $0x50] sm:$0xff]  }
 0x164   :  { %3269 = vmatpush1.bf16.msra.mxu0 %v5017_v29  ;;  %2892 = vmatprep.subr.bf16.mxu1 %v5022_v30  ;;  %v5067_v29 = vld [vmem:[%s6890_s3 + $0x10] sm:$0xff]   ;;  %v5068_v30 = vld [vmem:[%s6890_s3 + $0x58] sm:$0xff]  }
 0x165   :  { %3270 = vmatprep.subr.bf16.mxu0 %v5025_v31  ;;  %v5069_v31 = vld [vmem:[%s6890_s3 + $0x18] sm:$0xff]  }
 0x167   :  { %2893 = vmatpush1.bf16.msra.mxu1 %v5020_v32  ;;  %v5070_v32 = vld [vmem:[%s6890_s3 + $0x60] sm:$0xff]  }
 0x168   :  { %3271 = vmatpush1.bf16.msra.mxu0 %v5023_v33  ;;  %2894 = vmatprep.subr.bf16.mxu1 %v5028_v34  ;;  %v5071_v33 = vld [vmem:[%s6890_s3 + $0x20] sm:$0xff]   ;;  %v5072_v34 = vld [vmem:[%s6890_s3 + $0x68] sm:$0xff]  }
 0x169   :  { %3272 = vmatprep.subr.bf16.mxu0 %v5031_v35  ;;  %v5073_v35 = vld [vmem:[%s6890_s3 + $0x28] sm:$0xff]  }
 0x16b   :  { %2895 = vmatpush1.bf16.msra.mxu1 %v5026_v36  ;;  %v5074_v36 = vld [vmem:[%s6890_s3 + $0x70] sm:$0xff]  }
 0x16c   :  { %3273 = vmatpush1.bf16.msra.mxu0 %v5029_v37  ;;  %2896 = vmatprep.subr.bf16.mxu1 %v5034_v38  ;;  %v5075_v37 = vld [vmem:[%s6890_s3 + $0x30] sm:$0xff]   ;;  %v5076_v38 = vld [vmem:[%s6890_s3 + $0x78] sm:$0xff]  }
 0x16d   :  { %3274 = vmatprep.subr.bf16.mxu0 %v5037_v39  ;;  %v5077_v39 = vld [vmem:[%s6890_s3 + $0x38] sm:$0xff]  }
 0x16f   :  { %2897 = vmatpush1.bf16.msra.mxu1 %v5032_v40  ;;  %v629_v40 = vlaneseq }
 0x170   :  { %3275 = vmatpush1.bf16.msra.mxu0 %v5035_v41  ;;  %2898 = vmatprep.subr.bf16.mxu1 %v5040_v42 }
 0x171   :  { %3276 = vmatprep.subr.bf16.mxu0 %v5043_v43  ;;  %v630_v41 = vshrl.u32 %v629_v40, 7  ;;  %v627_v43 = vld [vmem:[%s6889_s2] sm:$0x3] }
 0x173   :  { %2899 = vmatpush1.bf16.msra.mxu1 %v5038_v44  ;;  %v631_v42 = vsub.s32 0, %v630_v41  ;;  %v635_v44 = vsub.s32 1, %v630_v41 }
 0x174   :  { %3277 = vmatpush1.bf16.msra.mxu0 %v5041_v45  ;;  %2900 = vmatprep.subr.bf16.mxu1 %v5046_v46 }
 0x175   :  { %3278 = vmatprep.subr.bf16.mxu0 %v5049_v47  ;;  %v6831_v45 = vrot.slane %v627_v43, %v631_v42  ;;  %v6833_v46 = vrot.slane %v627_v43, %v635_v44 }
 0x177   :  { %2901 = vmatpush1.bf16.msra.mxu1 %v5044_v48 }
 0x178   :  { %3279 = vmatpush1.bf16.msra.mxu0 %v5047_v49  ;;  %2902 = vmatprep.subr.bf16.mxu1 %v5052_v50 }
 0x179   :  { %3280 = vmatprep.subr.bf16.mxu0 %v5055_v51 }
 0x17b   :  { %2903 = vmatpush1.bf16.msra.mxu1 %v5050_v52 }
 0x17c   :  { %3281 = vmatpush1.bf16.msra.mxu0 %v5053_v53  ;;  %2904 = vmatprep.subr.bf16.mxu1 %v5058_v54 }
 0x17d   :  { %3282 = vmatprep.subr.bf16.mxu0 %v5061_v55 }
 0x17f   :  { %2905 = vmatpush1.bf16.msra.mxu1 %v5056_v56 }
 0x180   :  { %3283 = vmatpush1.bf16.msra.mxu0 %v5059_v57 }
 0x181   :  { %4279 = vmatprep.subr.bf16.mxu0 %v5062_v24 }
 0x182   :  { %2907 = vmatmul.mubr.bf16.vlgmr.msra.gmra.mrb[0].mxu1 %v181_v2 }
 0x183   :  { %3285 = vmatmul.mubr.bf16.vlgmr.msra.gmra.mrb[0].mxu0 %v193_v3  ;;  %2916 = vmatprep.mubr.bf16.mxu1 %v206_v4 }
 0x184   :  { %3294 = vmatprep.mubr.bf16.mxu0 %v218_v5  ;;  %4280 = vmatpush3.bf16.msra.mxu0 %v5063_v25 }
 0x185   :  { %4281 = vmatprep.subr.bf16.mxu0 %v5064_v26 }
 0x188   :  { %4282 = vmatpush3.bf16.msra.mxu0 %v5065_v27 }
 0x189   :  { %4283 = vmatprep.subr.bf16.mxu0 %v5066_v28 }
 0x18a   :  { %2917 = vmatmul.mubr.bf16.gmra.mrb[4].mxu1 %v205_v14 }
 0x18b   :  { %3295 = vmatmul.mubr.bf16.gmra.mrb[4].mxu0 %v217_v15  ;;  %2926 = vmatprep.mubr.bf16.mxu1 %v230_v16 }
 0x18c   :  { %3304 = vmatprep.mubr.bf16.mxu0 %v242_v17  ;;  %4284 = vmatpush3.bf16.msra.mxu0 %v5067_v29 }
 0x18d   :  { %4285 = vmatprep.subr.bf16.mxu0 %v5068_v30 }
 0x190   :  { %4286 = vmatpush3.bf16.msra.mxu0 %v5069_v31 }
 0x191   :  { %4287 = vmatprep.subr.bf16.mxu0 %v5070_v32 }
 0x192   :  { %2927 = vmatmul.mubr.bf16.gmra.mrb[8].mxu1 %v229_v22 }
 0x193   :  { %3305 = vmatmul.mubr.bf16.gmra.mrb[8].mxu0 %v241_v23 }
 0x194   :  { %4288 = vmatpush3.bf16.msra.mxu0 %v5071_v33 }
 0x195   :  { %4289 = vmatprep.subr.bf16.mxu0 %v5072_v34 }
 0x198   :  { %4290 = vmatpush3.bf16.msra.mxu0 %v5073_v35 }
 0x199   :  { %4291 = vmatprep.subr.bf16.mxu0 %v5074_v36 }
 0x19c   :  { %4292 = vmatpush3.bf16.msra.mxu0 %v5075_v37 }
 0x19d   :  { %4293 = vmatprep.subr.bf16.mxu0 %v5076_v38 }
 0x1a0   :  { %4294 = vmatpush3.bf16.msra.mxu0 %v5077_v39 }
 0x255   :  { %v2908_v47 = vpop.f32.mrb[0].mxu1 }
 0x256   :  { %v3286_v48 = vpop.f32.mrb[0].mxu0  ;;  %v4340_v49 = vadd.f32 %v2908_v47, %v6831_v45  ;;  %v2910_v50 = vpop.f32.mrb[1].mxu1 }
 0x257   :  { %v3288_v51 = vpop.f32.mrb[1].mxu0  ;;  %v4342_v52 = vadd.f32 %v2910_v50, %v6833_v46  ;;  %v2912_v53 = vpop.f32.mrb[2].mxu1 }
 0x258   :  { %v3290_v54 = vpop.f32.mrb[2].mxu0  ;;  %v4341_v55 = vadd.f32 %v4340_v49, %v3286_v48  ;;  %v4344_v56 = vadd.f32 %v2912_v53, %v6831_v45  ;;  %v2914_v57 = vpop.f32.mrb[3].mxu1 }
 0x259   :  { %v3292_v58 = vpop.f32.mrb[3].mxu0  ;;  %v4343_v59 = vadd.f32 %v4342_v52, %v3288_v51  ;;  %v4346_v60 = vadd.f32 %v2914_v57, %v6833_v46 }
 0x25a   :  { %v4207_v61 = vmul.f32 -1.442695, %v4341_v55  ;;  %v4345_v62 = vadd.f32 %v4344_v56, %v3290_v54 }
 0x25b   :  { %v4208_v63 = vmul.f32 -1.442695, %v4343_v59  ;;  %v4347_v0 = vadd.f32 %v4346_v60, %v3292_v58 }
 0x25c   :  { %5082 = vpow2.f32 %v4207_v61  ;;  %v4209_v1 = vmul.f32 -1.442695, %v4345_v62 }
 0x25d   :  { %5084 = vpow2.f32 %v4208_v63  ;;  %v4210_v2 = vmul.f32 -1.442695, %v4347_v0  ;;  %v2918_v3 = vpop.f32.mrb[4].mxu1 }
 0x25e   :  { %v3296_v4 = vpop.f32.mrb[4].mxu0  ;;  %5086 = vpow2.f32 %v4209_v1  ;;  %v4348_v5 = vadd.f32 %v2918_v3, %v6831_v45  ;;  %v2920_v6 = vpop.f32.mrb[5].mxu1 }
 0x25f   :  { %v3298_v7 = vpop.f32.mrb[5].mxu0  ;;  %5088 = vpow2.f32 %v4210_v2  ;;  %v4350_v8 = vadd.f32 %v2920_v6, %v6833_v46  ;;  %v2922_v9 = vpop.f32.mrb[6].mxu1 }
 0x260   :  { %v3300_v10 = vpop.f32.mrb[6].mxu0  ;;  %v4349_v11 = vadd.f32 %v4348_v5, %v3296_v4  ;;  %v4352_v12 = vadd.f32 %v2922_v9, %v6831_v45  ;;  %v2924_v13 = vpop.f32.mrb[7].mxu1 }
 0x261   :  { %v3302_v14 = vpop.f32.mrb[7].mxu0  ;;  %v4351_v15 = vadd.f32 %v4350_v8, %v3298_v7  ;;  %v4354_v16 = vadd.f32 %v2924_v13, %v6833_v46 }
 0x262   :  { %v4211_v17 = vmul.f32 -1.442695, %v4349_v11  ;;  %v4353_v18 = vadd.f32 %v4352_v12, %v3300_v10 }
 0x263   :  { %v4212_v19 = vmul.f32 -1.442695, %v4351_v15  ;;  %v4355_v20 = vadd.f32 %v4354_v16, %v3302_v14 }
 0x264   :  { %5090 = vpow2.f32 %v4211_v17  ;;  %v4213_v21 = vmul.f32 -1.442695, %v4353_v18 }
 0x265   :  { %5092 = vpow2.f32 %v4212_v19  ;;  %v4214_v22 = vmul.f32 -1.442695, %v4355_v20  ;;  %v2928_v23 = vpop.f32.mrb[8].mxu1 }
 0x266   :  { %v3306_v24 = vpop.f32.mrb[8].mxu0  ;;  %v5083_v25 = vpop.eup %5082  ;;  %5094 = vpow2.f32 %v4213_v21  ;;  %v4356_v26 = vadd.f32 %v2928_v23, %v6831_v45  ;;  %v5078_v21 = vld [vmem:[%s6892_s5] sm:$0xff]   ;;  %v5079_v23 = vld [vmem:[%s6892_s5 + $0x8] sm:$0xff]  }
 0x267   :  { %v2930_v27 = vpop.f32.mrb[9].mxu1  ;;  %v3308_v28 = vpop.f32.mrb[9].mxu0  ;;  %v3351_v30 = vadd.f32 1.0, %v5083_v25  ;;  %5096 = vpow2.f32 %v4214_v22  ;;  %v5154_v22 = vmov 0.0   ;;  %v5081_v25 = vld [vmem:[%s6892_s5 + $0x18] sm:$0xff]  }
 0x268   :  { %v5085_v29 = vpop.eup %5084  ;;  %v4358_v31 = vadd.f32 %v2930_v27, %v6833_v46  ;;  %v2932_v32 = vpop.f32.mrb[10].mxu1  ;;  %v4357_v36 = vadd.f32 %v4356_v26, %v3306_v24  ;;  %4320 = vmatprep.subr.bf16.mxu1 %v5154_v22  ;;  %v5080_v24 = vld [vmem:[%s6892_s5 + $0x10] sm:$0xff]   ;;  %4328 = vmatprep.mubr.msk.bf16.mxu1 %vm5155_vm0, %v5154_v22  ;;  %v4219_v27 = vld [vmem:[%s6891_s4] ss:$0 sm:$0xff] }
 0x269   :  { %v3310_v33 = vpop.f32.mrb[10].mxu0  ;;  %v5087_v34 = vpop.eup %5086  ;;  %v3352_v35 = vadd.f32 1.0, %v5085_v29  ;;  %v4360_v37 = vadd.f32 %v2932_v32, %v6831_v45  ;;  %5098 = vrcp.f32 %v3351_v30  ;;  %4321 = vmatpush3.bf16.msra.mxu1 %v5078_v21 }
 0x26a   :  { %v2934_v38 = vpop.f32.mrb[11].mxu1  ;;  %v3312_v39 = vpop.f32.mrb[11].mxu0  ;;  %v3353_v41 = vadd.f32 1.0, %v5087_v34  ;;  %v4359_v42 = vadd.f32 %v4358_v31, %v3308_v28  ;;  %v4215_v47 = vmul.f32 -1.442695, %v4357_v36  ;;  %4322 = vmatprep.subr.bf16.mxu1 %v5154_v22 }
 0x26b   :  { %v5089_v40 = vpop.eup %5088  ;;  %v4362_v43 = vadd.f32 %v2934_v38, %v6833_v46  ;;  %5100 = vrcp.f32 %v3352_v35  ;;  %v4361_v48 = vadd.f32 %v4360_v37, %v3310_v33 }
 0x26c   :  { %v3354_v44 = vadd.f32 1.0, %v5089_v40  ;;  %5102 = vrcp.f32 %v3353_v41  ;;  %v4216_v49 = vmul.f32 -1.442695, %v4359_v42 }
 0x26d   :  { %v4363_v50 = vadd.f32 %v4362_v43, %v3312_v39  ;;  %v4217_v51 = vmul.f32 -1.442695, %v4361_v48  ;;  %4323 = vmatpush3.bf16.msra.mxu1 %v5079_v23 }
 0x26e   :  { %5104 = vrcp.f32 %v3354_v44  ;;  %v5091_v45 = vpop.eup %5090  ;;  %4324 = vmatprep.subr.bf16.mxu1 %v5154_v22 }
 0x26f   :  { %5106 = vpow2.f32 %v4215_v47  ;;  %v4218_v52 = vmul.f32 -1.442695, %v4363_v50  ;;  %v5093_v53 = vpop.eup %5092  ;;  %v3355_v54 = vadd.f32 1.0, %v5091_v45 }
 0x270   :  { %5108 = vpow2.f32 %v4216_v49  ;;  %v5095_v55 = vpop.eup %5094  ;;  %v3356_v56 = vadd.f32 1.0, %v5093_v53 }
 0x271   :  { %5110 = vpow2.f32 %v4217_v51  ;;  %v5097_v46 = vpop.eup %5096  ;;  %v3357_v57 = vadd.f32 1.0, %v5095_v55  ;;  %4325 = vmatpush3.bf16.msra.mxu1 %v5080_v24 }
 0x272   :  { %5112 = vpow2.f32 %v4218_v52  ;;  %v3358_v58 = vadd.f32 1.0, %v5097_v46  ;;  %4326 = vmatprep.subr.bf16.mxu1 %v5154_v22 }
 0x273   :  { %5114 = vrcp.f32 %v3355_v54  ;;  %v5099_v59 = vpop.eup %5098 }
 0x274   :  { %5116 = vrcp.f32 %v3356_v56 }
 0x275   :  { %5118 = vrcp.f32 %v3357_v57  ;;  %v5101_v60 = vpop.eup %5100  ;;  %4327 = vmatpush3.bf16.msra.mxu1 %v5081_v25 }
 0x276   :  { %5120 = vrcp.f32 %v3358_v58  ;;  %v5103_v61 = vpop.eup %5102 }
 0x277   :  { %v3387_v63 = vpack.c.bf16 %v5103_v61, %v5099_v59 }
 0x278   :  { %v5105_v62 = vpop.eup %5104 }
 0x279   :  { %v5107_v0 = vpop.eup %5106  ;;  %v3388_v1 = vpack.c.bf16 %v5105_v62, %v5101_v60 }
 0x27a   :  { %v5109_v2 = vpop.eup %5108  ;;  %v3359_v3 = vadd.f32 1.0, %v5107_v0 }
 0x27b   :  { %v5111_v4 = vpop.eup %5110  ;;  %v3360_v5 = vadd.f32 1.0, %v5109_v2  ;;  %3560 = vmatprep.mubr.bf16.mxu0 %v3388_v1 }
 0x27c   :  { %v5113_v6 = vpop.eup %5112  ;;  %5122 = vrcp.f32 %v3359_v3  ;;  %v3361_v7 = vadd.f32 1.0, %v5111_v4  ;;  %3561 = vmatmul.mubr.bf16.vlgmr.msra.gmra.mrb[12].mxu0 %v3387_v63 }
 0x27d   :  { %v5115_v8 = vpop.eup %5114  ;;  %5124 = vrcp.f32 %v3360_v5  ;;  %v3362_v9 = vadd.f32 1.0, %v5113_v6 }
 0x27e   :  { %v5117_v10 = vpop.eup %5116  ;;  %5126 = vrcp.f32 %v3361_v7 }
 0x27f   :  { %v5119_v11 = vpop.eup %5118  ;;  %5128 = vrcp.f32 %v3362_v9 }
 0x280   :  { %v5121_v12 = vpop.eup %5120  ;;  %v3389_v13 = vpack.c.bf16 %v5119_v11, %v5115_v8 }
 0x281   :  { %v3390_v14 = vpack.c.bf16 %v5121_v12, %v5117_v10 }
 0x283   :  { %3568 = vmatprep.mubr.bf16.mxu0 %v3390_v14  ;;  %v4242_v14 = vld [vmem:[%s6893_s6] ss:$0 sm:$0xff] }
 0x284   :  { %3569 = vmatmul.mubr.bf16.gmra.mrb[16].mxu0 %v3389_v13 }
 0x286   :  { %v5123_v15 = vpop.eup %5122 }
 0x287   :  { %v5125_v16 = vpop.eup %5124 }
 0x288   :  { %v5127_v17 = vpop.eup %5126 }
 0x289   :  { %v5129_v18 = vpop.eup %5128  ;;  %v3391_v19 = vpack.c.bf16 %v5127_v17, %v5123_v15 }
 0x28a   :  { %v3392_v20 = vpack.c.bf16 %v5129_v18, %v5125_v16 }
 0x28c   :  { %3576 = vmatprep.mubr.bf16.mxu0 %v3392_v20 }
 0x28d   :  { %3577 = vmatmul.mubr.bf16.gmra.mrb[20].mxu0 %v3391_v19 }
 0x34f   :  { %v4295_v26 = vpop.f32.mrb[12].mxu0 }
 0x350   :  { %v4296_v28 = vpop.f32.mrb[13].mxu0 }
 0x351   :  { %v4297_v29 = vadd.f32 %v4296_v28, %v4295_v26  ;;  %v4298_v30 = vpop.f32.mrb[14].mxu0 }
 0x352   :  { %v4299_v31 = vpop.f32.mrb[15].mxu0 }
 0x353   :  { %v3563_v32 = vadd.f32 %v4297_v29, %v4219_v27  ;;  %v4300_v33 = vadd.f32 %v4299_v31, %v4298_v30 }
 0x355   :  { %v4236_v34 = vmul.f32 -1.442695, %v3563_v32  ;;  %v3566_v35 = vadd.f32 %v4300_v33, %v4219_v27 }
 0x357   :  { %5130 = vpow2.f32 %v4236_v34  ;;  %v4237_v36 = vmul.f32 -1.442695, %v3566_v35  ;;  %v4301_v37 = vpop.f32.mrb[16].mxu0 }
 0x358   :  { %v4302_v38 = vpop.f32.mrb[17].mxu0 }
 0x359   :  { %5132 = vpow2.f32 %v4237_v36  ;;  %v4303_v39 = vadd.f32 %v4302_v38, %v4301_v37  ;;  %v4304_v40 = vpop.f32.mrb[18].mxu0 }
 0x35a   :  { %v4305_v41 = vpop.f32.mrb[19].mxu0 }
 0x35b   :  { %v3571_v42 = vadd.f32 %v4303_v39, %v4219_v27  ;;  %v4306_v43 = vadd.f32 %v4305_v41, %v4304_v40 }
 0x35d   :  { %v4238_v44 = vmul.f32 -1.442695, %v3571_v42  ;;  %v3574_v47 = vadd.f32 %v4306_v43, %v4219_v27 }
 0x35f   :  { %5134 = vpow2.f32 %v4238_v44  ;;  %v4239_v48 = vmul.f32 -1.442695, %v3574_v47 }
 0x360   :  { %v4307_v49 = vpop.f32.mrb[20].mxu0 }
 0x361   :  { %v5131_v50 = vpop.eup %5130  ;;  %5136 = vpow2.f32 %v4239_v48  ;;  %v4308_v51 = vpop.f32.mrb[21].mxu0 }
 0x362   :  { %v3603_v52 = vadd.f32 1.0, %v5131_v50  ;;  %v4309_v45 = vadd.f32 %v4308_v51, %v4307_v49  ;;  %v4310_v53 = vpop.f32.mrb[22].mxu0 }
 0x363   :  { %v5133_v54 = vpop.eup %5132  ;;  %v4311_v55 = vpop.f32.mrb[23].mxu0 }
 0x364   :  { %v3604_v56 = vadd.f32 1.0, %v5133_v54  ;;  %v3579_v46 = vadd.f32 %v4309_v45, %v4219_v27  ;;  %v4312_v57 = vadd.f32 %v4311_v55, %v4310_v53  ;;  %5138 = vrcp.f32 %v3603_v52 }
 0x366   :  { %5140 = vrcp.f32 %v3604_v56  ;;  %v4240_v58 = vmul.f32 -1.442695, %v3579_v46  ;;  %v3582_v59 = vadd.f32 %v4312_v57, %v4219_v27 }
 0x368   :  { %5142 = vpow2.f32 %v4240_v58  ;;  %v4241_v60 = vmul.f32 -1.442695, %v3582_v59 }
 0x369   :  { %v5135_v61 = vpop.eup %5134 }
 0x36a   :  { %v3605_v62 = vadd.f32 1.0, %v5135_v61  ;;  %5144 = vpow2.f32 %v4241_v60 }
 0x36b   :  { %v5137_v63 = vpop.eup %5136 }
 0x36c   :  { %v3606_v0 = vadd.f32 1.0, %v5137_v63  ;;  %5146 = vrcp.f32 %v3605_v62 }
 0x36e   :  { %5148 = vrcp.f32 %v3606_v0  ;;  %v5139_v1 = vpop.eup %5138 }
 0x370   :  { %v5141_v2 = vpop.eup %5140 }
 0x371   :  { %v3621_v3 = vpack.c.bf16 %v5141_v2, %v5139_v1 }
 0x372   :  { %v5143_v4 = vpop.eup %5142 }
 0x373   :  { %v3607_v5 = vadd.f32 1.0, %v5143_v4  ;;  %4329 = vmatmul.mubr.msk.bf16.vlgmr.msra.gmra.mrb[12].mxu1 %vm3663_vm1, %v3621_v3 }
 0x374   :  { %v5145_v6 = vpop.eup %5144  ;;  %4332 = vmatprep.mubr.msk.bf16.mxu1 %vm5155_vm0, %v5154_v22 }
 0x375   :  { %v3608_v7 = vadd.f32 1.0, %v5145_v6  ;;  %5150 = vrcp.f32 %v3607_v5 }
 0x376   :  { %v5147_v8 = vpop.eup %5146 }
 0x377   :  { %5152 = vrcp.f32 %v3608_v7 }
 0x378   :  { %v5149_v9 = vpop.eup %5148 }
 0x379   :  { %v3622_v10 = vpack.c.bf16 %v5149_v9, %v5147_v8 }
 0x37b   :  { %4333 = vmatmul.mubr.msk.bf16.gmra.mrb[16].mxu1 %vm3663_vm1, %v3622_v10 }
 0x37c   :  { %4336 = vmatprep.mubr.msk.bf16.mxu1 %vm5155_vm0, %v5154_v22 }
 0x37f   :  { %v5151_v11 = vpop.eup %5150 }
 0x381   :  { %v5153_v12 = vpop.eup %5152 }
 0x382   :  { %v3623_v13 = vpack.c.bf16 %v5153_v12, %v5151_v11 }
 0x384   :  { %4337 = vmatmul.mubr.msk.bf16.gmra.mrb[20].mxu1 %vm3663_vm1, %v3623_v13 }
 0x446   :  { %v3707_v15 = vpop.f32.mrb[12].mxu1 }
 0x447   :  { %v4330_v16 = vpop.f32.mrb[13].mxu1  ;;  %v3708_v18 = vadd.f32 %v4242_v14, %v3707_v15 }
 0x448   :  { %v3710_v17 = vpop.f32.mrb[14].mxu1 }
 0x449   :  { %v3711_v19 = vadd.f32 %v4242_v14, %v3710_v17  ;;  %v4331_v20 = vpop.f32.mrb[15].mxu1 }
 0x44b   :  { %v4265_v21 = vpack.c.bf16 %v3711_v19, %v3708_v18 }
 0x44d   :  { %4266 = vst [vmem:[#allocation2] sm:$0xff] %v4265_v21  }
 0x44e   :  { %v3715_v23 = vpop.f32.mrb[16].mxu1 }
 0x44f   :  { %v4334_v24 = vpop.f32.mrb[17].mxu1  ;;  %v3716_v25 = vadd.f32 %v4242_v14, %v3715_v23 }
 0x450   :  { %v3718_v22 = vpop.f32.mrb[18].mxu1 }
 0x451   :  { %v3719_v26 = vadd.f32 %v4242_v14, %v3718_v22  ;;  %v4335_v27 = vpop.f32.mrb[19].mxu1 }
 0x453   :  { %v4270_v28 = vpack.c.bf16 %v3719_v26, %v3716_v25 }
 0x454   :  { %v3777_v29 = vld [vmem:[#allocation2] sm:$0xff]  }
 0x455   :  { %3778 = vst [vmem:[%s6894_s7] sm:$0xff] %v3777_v29   ;;  %4277 = vst [vmem:[#allocation2 + $0x8] sm:$0xff] %v4270_v28  }
 0x457   :  { %v3723_v30 = vpop.f32.mrb[20].mxu1 }
 0x458   :  { %v4338_v31 = vpop.f32.mrb[21].mxu1  ;;  %v3724_v33 = vadd.f32 %v4242_v14, %v3723_v30 }
 0x459   :  { %v3726_v32 = vpop.f32.mrb[22].mxu1 }
 0x45a   :  { %v3727_v34 = vadd.f32 %v4242_v14, %v3726_v32  ;;  %v4339_v35 = vpop.f32.mrb[23].mxu1 }
 0x45c   :  { %v3781_v36 = vld [vmem:[#allocation2 + $0x8] sm:$0xff]   ;;  %v4275_v37 = vpack.c.bf16 %v3727_v34, %v3724_v33 }
 0x45d   :  { %3782 = vst [vmem:[%s6894_s7 + $0x8] sm:$0xff] %v3781_v36  }
 0x45e   :  { %4278 = vst [vmem:[#allocation2 + $0x10] sm:$0xff] %v4275_v37  }
 0x465   :  { %v3785_v38 = vld [vmem:[#allocation2 + $0x10] sm:$0xf] }
 0x466   :  { %3786 = vst [vmem:[%s6894_s7 + $0x10] sm:$0xf] %v3785_v38 }

</bundles_post_ra>
